<compile_context>
chip_gen: v7x
topology: tpu7x:2x2x1
jax: 0.10.0
libtpu: 0.0.40
codegen_flags: <defaults>
</compile_context>

<pallas_src>
import functools
import warnings

import numpy as np
import jax
import jax.numpy as jnp
from jax.experimental import pallas as pl
from jax.experimental.pallas import tpu as pltpu


def featencode_kernel(f4_ref, ts4_ref, ew_ref, wf4_ref, wt4_ref, b_ref, o_ref):
    # f4_ref : (tmR, R*F)    lane-folded raw edge features (R rows per vector row)
    # ts4_ref: (tmR, R)      lane-folded timestamps
    # ew_ref : (R, R*T)      block-diagonal frozen TimeEncode weights
    # wf4_ref: (R*F, R*O)    block-diagonal feats part of the Linear weight
    # wt4_ref: (R*T, R*O)    block-diagonal time part of the Linear weight
    # b_ref  : (1, R*O)      bias tiled R times along lanes
    # o_ref  : (tmR, R*O)    lane-folded output
    #
    # Time encoding directly in the folded layout: dot((tmR,R),(R,R*T)) places
    # ts[group j] * w[:] into lane block j, then cos runs on full 128-lane vregs.
    tf4 = jnp.cos(jnp.dot(ts4_ref[...], ew_ref[...],
                          preferred_element_type=jnp.float32))            # (tmR, R*T)
    # Linear as two dots (no in-kernel concat / VMEM temp): concat is on the K axis,
    # so x @ W_cat == feats @ W_feat + time_feats @ W_time.
    acc = jnp.dot(f4_ref[...], wf4_ref[...],
                  preferred_element_type=jnp.float32)                     # (tmR, R*O)
    acc = acc + jnp.dot(tf4, wt4_ref[...],
                        preferred_element_type=jnp.float32)               # (tmR, R*O)
    o_ref[...] = (acc + b_ref[...]).astype(o_ref.dtype)


def _fold_factor(out_dims):
    """Rows folded into the 128-lane axis so output stores are lane-dense."""
    if 0 < out_dims <= 128 and 128 % out_dims == 0:
        return 128 // out_dims
    warnings.warn("FeatEncode Pallas kernel: out_dims does not divide 128; "
                  "falling back to lane-sparse (masked) stores (R=1).")
    return 1


def prepare_fused_weights(time_w_vec, w_feat, w_time, bias):
    """One-time constant preprocessing (hoisted out of the per-call path).

    time_w_vec: (T,) frozen TimeEncode weights; w_feat: (F, O); w_time: (T, O);
    bias: (O,).  Returns (ew, wf4, wt4, b4) block-diagonal / lane-tiled params.
    """
    T = int(time_w_vec.shape[0])
    O = int(w_feat.shape[1])
    R = _fold_factor(O)
    eye_r = jnp.eye(R, dtype=jnp.float32)
    ew = jnp.kron(eye_r, time_w_vec.reshape(1, T).astype(jnp.float32))    # (R, R*T)
    wf4 = jnp.kron(eye_r, w_feat.astype(jnp.float32))                     # (R*F, R*O)
    wt4 = jnp.kron(eye_r, w_time.astype(jnp.float32))                     # (R*T, R*O)
    b4 = jnp.tile(bias.reshape(1, O).astype(jnp.float32), (1, R))         # (1, R*O)
    return ew, wf4, wt4, b4


@functools.partial(jax.jit, static_argnames=("tm",))
def feat_encode(edge_feats, edge_ts, ew, wf4, wt4, b4, *, tm=4096):
    """edge_feats: (N, F) f32; edge_ts: (N,) or (N,1) f32; (ew, wf4, wt4, b4) from
    prepare_fused_weights.  Returns (N, O) f32."""
    N, F = edge_feats.shape
    R = int(ew.shape[0])
    O = int(wf4.shape[1]) // R

    edge_feats = edge_feats.astype(jnp.float32)
    edge_ts = edge_ts.reshape(-1).astype(jnp.float32)

    # Pad only to a multiple of R (<= R-1 rows) so the lane-folding reshape is legal.
    rem = N % R
    pad = (R - rem) if rem else 0
    if pad:
        edge_feats = jnp.pad(edge_feats, ((0, pad), (0, 0)))
        edge_ts = jnp.pad(edge_ts, (0, pad))
    Np = N + pad
    NR = Np // R

    # Row-major lane folding (metadata-only reshapes).
    f4 = edge_feats.reshape(NR, R * F)          # (NR, R*F)
    ts4 = edge_ts.reshape(NR, R)                # (NR, R)

    # Row tile: tmR rows of the folded arrays (= tmR*R original rows), multiple of 8
    # sublanes, clamped to the (sublane-rounded) problem size.  The ragged last block
    # is handled by the grid (masked partial block), no padding to a tm multiple.
    tmR = max(8, (int(tm) // (R * 8)) * 8)
    NR8 = ((NR + 7) // 8) * 8
    tmR = min(tmR, NR8)
    n_steps = pl.cdiv(NR, tmR)

    out4 = pl.pallas_call(
        featencode_kernel,
        out_shape=jax.ShapeDtypeStruct((NR, R * O), jnp.float32),
        grid_spec=pltpu.PrefetchScalarGridSpec(
            num_scalar_prefetch=0,
            grid=(n_steps,),
            in_specs=[
                pl.BlockSpec((tmR, R * F), lambda i: (i, 0)),   # folded feats (streamed)
                pl.BlockSpec((tmR, R), lambda i: (i, 0)),       # folded timestamps
                pl.BlockSpec((R, R * T_static(ew)), lambda i: (0, 0)),  # time weights
                pl.BlockSpec((R * F, R * O), lambda i: (0, 0)),  # Linear W (feats part)
                pl.BlockSpec((wt4.shape[0], R * O), lambda i: (0, 0)),  # Linear W (time part)
                pl.BlockSpec((1, R * O), lambda i: (0, 0)),      # bias (lane-tiled)
            ],
            out_specs=pl.BlockSpec((tmR, R * O), lambda i: (i, 0)),
        ),
        compiler_params=pltpu.CompilerParams(
            dimension_semantics=("parallel",)),
    )(f4, ts4, ew, wf4, wt4, b4)

    # Unfold back to (Np, O); the slice is absent when N % R == 0, otherwise tiny.
    out = out4.reshape(Np, O)
    if pad:
        out = out[:N]
    return out


def T_static(ew):
    # Static helper: time_dims from the block-diagonal TimeEncode weight shape.
    return int(ew.shape[1]) // int(ew.shape[0])


if __name__ == "__main__":
    # Small, module-consistent sizes; N chosen so the grid has several steps and the
    # last row-block is ragged (exercises partial-block masking), with N % R == 0 so
    # no wrapper-side pad/slice occurs at all.
    time_dims, feat_dims, out_dims = 32, 32, 32
    N = 1000
    tm = 256          # -> tmR=64, grid of 4 steps (last block partial: 58/64 rows)

    key = jax.random.PRNGKey(0)
    k_feat, k_ts, k_w, k_b = jax.random.split(key, 4)

    edge_feats = jax.random.normal(k_feat, (N, feat_dims), dtype=jnp.float32)
    edge_ts = jax.random.uniform(k_ts, (N,), dtype=jnp.float32) * 100.0

    # --- TimeEncode parameters (frozen, as in reset_parameters) ---
    # w.weight = 1 / 10**linspace(0, 9, time_dims), shape (time_dims, 1); bias = 0.
    time_w_vec = jnp.asarray(
        (1.0 / 10.0 ** np.linspace(0, 9, time_dims, dtype=np.float32)).astype(np.float32))

    # --- feat_encoder Linear parameters: weight (out, time+feat), bias (out,) ---
    # Deterministic synthetic init (PyTorch would use kaiming-uniform; shapes/semantics match).
    fan_in = time_dims + feat_dims
    bound = 1.0 / np.sqrt(fan_in)
    W = jax.random.uniform(k_w, (out_dims, fan_in), dtype=jnp.float32,
                           minval=-bound, maxval=bound)
    b = jax.random.uniform(k_b, (out_dims,), dtype=jnp.float32,
                           minval=-bound, maxval=bound)

    # Split W columns to match cat order: [edge_feats | time_feats].
    w_feat = W[:, :feat_dims].T            # (F, O)
    w_time = W[:, feat_dims:].T            # (T, O)

    # One-time constant preprocessing (outside the per-call path).
    ew, wf4, wt4, b4 = prepare_fused_weights(time_w_vec, w_feat, w_time, b)

    out = feat_encode(edge_feats, edge_ts, ew, wf4, wt4, b4, tm=tm)
    out = jax.block_until_ready(out)

    # Pure-JAX reference of the original concat-then-Linear forward pass.
    time_feats_ref = jnp.cos(edge_ts.reshape(N, 1) * time_w_vec.reshape(1, time_dims))
    x_ref = jnp.concatenate([edge_feats, time_feats_ref], axis=1)
    ref = x_ref @ W.T + b
    np.testing.assert_allclose(np.asarray(out), np.asarray(ref), rtol=1e-5, atol=1e-4)

    print("KERNEL_OK")
</pallas_src>

<mosaic_0001>
module attributes {stable_mosaic.version = 11 : i64} {
  func.func @featencode_kernel(%arg0: i32, %arg1: memref<64x128xf32, #tpu.memory_space<vmem>>, %arg2: memref<64x4xf32, #tpu.memory_space<vmem>>, %arg3: memref<4x128xf32, #tpu.memory_space<vmem>>, %arg4: memref<128x128xf32, #tpu.memory_space<vmem>>, %arg5: memref<128x128xf32, #tpu.memory_space<vmem>>, %arg6: memref<1x128xf32, #tpu.memory_space<vmem>>, %arg7: memref<64x128xf32, #tpu.memory_space<vmem>>) attributes {dimension_semantics = [#tpu.dimension_semantics<parallel>], iteration_bounds = array<i64: 4>, scalar_prefetch = 0 : i64, scratch_operands = 0 : i64, tpu.core_type = #tpu.core_type<tc>, window_params = [{transform_indices = @transform_0, window_bounds = array<i64: 64, 128>}, {transform_indices = @transform_1, window_bounds = array<i64: 64, 4>}, {pipeline_mode = #tpu.pipeline_mode<synchronous>, transform_indices = @transform_2, window_bounds = array<i64: 4, 128>}, {pipeline_mode = #tpu.pipeline_mode<synchronous>, transform_indices = @transform_3, window_bounds = array<i64: 128, 128>}, {pipeline_mode = #tpu.pipeline_mode<synchronous>, transform_indices = @transform_4, window_bounds = array<i64: 128, 128>}, {pipeline_mode = #tpu.pipeline_mode<synchronous>, transform_indices = @transform_5, window_bounds = array<i64: 1, 128>}, {transform_indices = @transform_6, window_bounds = array<i64: 64, 128>}]} {
    %c0 = arith.constant 0 : index
    %c0_0 = arith.constant 0 : index
    %0 = vector.load %arg2[%c0, %c0_0] : memref<64x4xf32, #tpu.memory_space<vmem>>, vector<64x4xf32>
    %c0_1 = arith.constant 0 : index
    %c0_2 = arith.constant 0 : index
    %1 = vector.load %arg3[%c0_1, %c0_2] : memref<4x128xf32, #tpu.memory_space<vmem>>, vector<4x128xf32>
    %cst = arith.constant dense<0.000000e+00> : vector<64x128xf32>
    %2 = tpu.matmul %0, %1, %cst {dimension_numbers = #tpu.dot_dimension_numbers<[1], [0], [0], [1], [0, 0, 1, 1], [], []>} : vector<64x4xf32>, vector<4x128xf32>, vector<64x128xf32> -> vector<64x128xf32>
    %3 = math.cos %2 : vector<64x128xf32>
    %c0_3 = arith.constant 0 : index
    %c0_4 = arith.constant 0 : index
    %4 = vector.load %arg1[%c0_3, %c0_4] : memref<64x128xf32, #tpu.memory_space<vmem>>, vector<64x128xf32>
    %c0_5 = arith.constant 0 : index
    %c0_6 = arith.constant 0 : index
    %5 = vector.load %arg4[%c0_5, %c0_6] : memref<128x128xf32, #tpu.memory_space<vmem>>, vector<128x128xf32>
    %cst_7 = arith.constant dense<0.000000e+00> : vector<64x128xf32>
    %6 = tpu.matmul %4, %5, %cst_7 {dimension_numbers = #tpu.dot_dimension_numbers<[1], [0], [0], [1], [0, 0, 1, 1], [], []>} : vector<64x128xf32>, vector<128x128xf32>, vector<64x128xf32> -> vector<64x128xf32>
    %c0_8 = arith.constant 0 : index
    %c0_9 = arith.constant 0 : index
    %7 = vector.load %arg5[%c0_8, %c0_9] : memref<128x128xf32, #tpu.memory_space<vmem>>, vector<128x128xf32>
    %cst_10 = arith.constant dense<0.000000e+00> : vector<64x128xf32>
    %8 = tpu.matmul %3, %7, %cst_10 {dimension_numbers = #tpu.dot_dimension_numbers<[1], [0], [0], [1], [0, 0, 1, 1], [], []>} : vector<64x128xf32>, vector<128x128xf32>, vector<64x128xf32> -> vector<64x128xf32>
    %9 = arith.addf %6, %8 : vector<64x128xf32>
    %c0_11 = arith.constant 0 : index
    %c0_12 = arith.constant 0 : index
    %10 = vector.load %arg6[%c0_11, %c0_12] : memref<1x128xf32, #tpu.memory_space<vmem>>, vector<1x128xf32>
    %11 = vector.broadcast %10 : vector<1x128xf32> to vector<64x128xf32>
    %12 = arith.addf %9, %11 : vector<64x128xf32>
    %c0_13 = arith.constant 0 : index
    %c0_14 = arith.constant 0 : index
    %13 = vector.load %arg7[%c0_13, %c0_14] : memref<64x128xf32, #tpu.memory_space<vmem>>, vector<64x128xf32>
    tpu.vector_store %arg7[%c0_13, %c0_14], %12 {strides = array<i32>} : memref<64x128xf32, #tpu.memory_space<vmem>>, vector<64x128xf32>,
    return
  }
  func.func @transform_0(%arg0: i32) -> (i32, i32) {
    %c0_i32 = arith.constant 0 : i32
    %c0_i32_0 = arith.constant 0 : i32
    return %arg0, %c0_i32 : i32, i32
  }
  func.func @transform_1(%arg0: i32) -> (i32, i32) {
    %c0_i32 = arith.constant 0 : i32
    %c0_i32_0 = arith.constant 0 : i32
    return %arg0, %c0_i32 : i32, i32
  }
  func.func @transform_2(%arg0: i32) -> (i32, i32) {
    %c0_i32 = arith.constant 0 : i32
    %c0_i32_0 = arith.constant 0 : i32
    %c0_i32_1 = arith.constant 0 : i32
    return %c0_i32, %c0_i32_0 : i32, i32
  }
  func.func @transform_3(%arg0: i32) -> (i32, i32) {
    %c0_i32 = arith.constant 0 : i32
    %c0_i32_0 = arith.constant 0 : i32
    %c0_i32_1 = arith.constant 0 : i32
    return %c0_i32, %c0_i32_0 : i32, i32
  }
  func.func @transform_4(%arg0: i32) -> (i32, i32) {
    %c0_i32 = arith.constant 0 : i32
    %c0_i32_0 = arith.constant 0 : i32
    %c0_i32_1 = arith.constant 0 : i32
    return %c0_i32, %c0_i32_0 : i32, i32
  }
  func.func @transform_5(%arg0: i32) -> (i32, i32) {
    %c0_i32 = arith.constant 0 : i32
    %c0_i32_0 = arith.constant 0 : i32
    %c0_i32_1 = arith.constant 0 : i32
    return %c0_i32, %c0_i32_0 : i32, i32
  }
  func.func @transform_6(%arg0: i32) -> (i32, i32) {
    %c0_i32 = arith.constant 0 : i32
    %c0_i32_0 = arith.constant 0 : i32
    return %arg0, %c0_i32 : i32, i32
  }
}

</mosaic_0001>

<bundles_post_ra>
// kernel: feat_encode.1
= control target key start
LH: loop header
LB: loop body
LE: loop exit
PB: predicated region body
PF: predicated region fallthrough
CT: control target
= control target key end

     0   :  { %s1998_s21 = smov 0   ;;  %s2859_s0 = inlined_call_operand.vmem [shape: f32[250,128], index: 0, kind: input, shape index: {}]   ;;  %s2860_s1 = inlined_call_operand.vmem [shape: f32[250,4], index: 1, kind: input, shape index: {}]   ;;  %s2861_s2 = inlined_call_operand.vmem [shape: f32[4,128], index: 2, kind: input, shape index: {}]   ;;  %s2862_s3 = inlined_call_operand.vmem [shape: f32[128,128], index: 3, kind: input, shape index: {}]   ;;  %s2863_s4 = inlined_call_operand.vmem [shape: f32[128,128], index: 4, kind: input, shape index: {}]   ;;  %s2864_s5 = inlined_call_operand.vmem [shape: f32[1,128], index: 5, kind: input, shape index: {}]   ;;  %s2865_s6 = inlined_call_operand.vmem [shape: f32[250,128], index: 6, kind: output, shape index: {}]  }
   0x1 LB: > { %s1585_s22 = sadd.s32 4294967295, %s1955_s21   ;;  %p1589_p0 = scmp.ge.s32.totalorder %s1955_s21, 1  ;;  %s1955_s21 = sphi %s1998_s21, %s16_s21  }
   0x2   : > { %p224_p1 = scmp.lt.s32.totalorder %s1955_s21, 5 }
   0x4   : > { %p225_p2 = pnand %p1589_p0, %p224_p1 }
   0x6   : > { %228 = sbr.rel (%p225_p2) target bundleno = 671 (0x29f), region = 44 }
   0xd   : > { %v285_v0 = vld [vmem:[%s2861_s2] sm:$0xf]  ;;  %vm311_vm0 = vcmask 1043456   ;;  %s1590_s25 = sshll.u32 %s1585_s22, 3  ;;  %vm286_vm1 = vcmask 31744  }
   0xe   : > { %1697 = vmatprep.subr.msk.mxu0 %vm311_vm0, %v285_v0  ;;  %p260_p3 = scmp.lt.s32.totalorder %s1590_s25, 31  ;;  %v2870_v45 = vmov 683565275   ;;  %v1958_v50 = vmov 2475754826  }
   0xf   : > { %1698 = vmatpush3.msk.msra.mxu0 %vm311_vm0, %v285_v0  ;;  %v1959_v52 = vmov 2131351028   ;;  %v1960_v54 = vmov 2102212464   ;;  %v1961_v56 = vmov 920167782  }
  0x10   : > { %s2898_s25 = smov (!%p260_p3, %s1590_s25), 31  ;;  %v2869_v63 = vmov 1326507024  }
  0x11   : > { %s2009_s26 = sshll.u32 %s2898_s25, 3 }
  0x12   : > { %s269_s29 = scalar_lea.vmem %s2860_s1, %s2009_s26  ;;  %s2249_s8 = scalar_lea.vmem %s2859_s0, %s2009_s26 }
  0x13   : > { %v277_v1 = vld [vmem:[%s269_s29] sm:$0xff]  ;;  %v278_v2 = vld [vmem:[%s269_s29 + $0x8] sm:$0xff]  ;;  %v279_v3 = vld [vmem:[%s269_s29 + $0x10] sm:$0xff]  ;;  %s2846_s13 = scalar_lea.vmem %s2865_s6, %s2009_s26 }
  0x14   : > { %1699 = vmatprep.mubr.msk.f32.mxu0 %vm286_vm1, %v277_v1  ;;  %v280_v4 = vld [vmem:[%s269_s29 + $0x18] sm:$0xff]  ;;  %v281_v5 = vld [vmem:[%s269_s29 + $0x20] sm:$0xff]  ;;  %v282_v6 = vld [vmem:[%s269_s29 + $0x28] sm:$0xff] }
  0x15   : > { %1700 = vmatmul.mubr.msk.f32.vlgmr.msra.gmra.mrb[0].mxu0 %vm286_vm1, %v278_v2  ;;  %v283_v7 = vld [vmem:[%s269_s29 + $0x30] sm:$0xff]  ;;  %v284_v8 = vld [vmem:[%s269_s29 + $0x38] sm:$0xff] }
  0x16   : > { %1702 = vmatprep.mubr.msk.f32.mxu0 %vm286_vm1, %v279_v3 }
  0x19   : > { %1703 = vmatmul.mubr.msk.f32.gmra.mrb[2].mxu0 %vm286_vm1, %v280_v4 }
  0x1a   : > { %1705 = vmatprep.mubr.msk.f32.mxu0 %vm286_vm1, %v281_v5 }
  0x1d   : > { %1706 = vmatmul.mubr.msk.f32.gmra.mrb[4].mxu0 %vm286_vm1, %v282_v6 }
  0x1e   : > { %1708 = vmatprep.mubr.msk.f32.mxu0 %vm286_vm1, %v283_v7 }
  0x21   : > { %1709 = vmatmul.mubr.msk.f32.gmra.mrb[6].mxu0 %vm286_vm1, %v284_v8 }
  0xe8   : > { %v2023_v9 = vpop.f32.mrb[0].mxu0 }
  0xe9   : > { %v523_v10 = vand.u32 2147483647, %v2023_v9  ;;  %v526_v11 = vand.u32 2139095040, %v2023_v9  ;;  %v2027_v12 = vpop.f32.mrb[1].mxu0 }
  0xea   : > { %v420_v13 = vand.u32 2147483647, %v2027_v12  ;;  %v423_v14 = vand.u32 2139095040, %v2027_v12 }
  0xeb   : > { %v527_v15 = vshrl.u32 %v526_v11, 23  ;;  %v530_v16 = vand.u32 8388607, %v523_v10 }
  0xec   : > { %v424_v17 = vshrl.u32 %v423_v14, 23  ;;  %v427_v18 = vand.u32 8388607, %v420_v13  ;;  %v2035_v19 = vpop.f32.mrb[2].mxu0 }
  0xed   : > { %v1609_v20 = vadd.s32 4294967169, %v527_v15  ;;  %v729_v21 = vand.u32 2147483647, %v2035_v19  ;;  %v2038_v22 = vpop.f32.mrb[3].mxu0  ;;  %v732_v24 = vand.u32 2139095040, %v2035_v19  ;;  %v531_v25 = vor.u32 8388608, %v530_v16 }
  0xee   : > { %v1605_v23 = vadd.s32 4294967169, %v424_v17  ;;  %v428_v27 = vor.u32 8388608, %v427_v18  ;;  %v626_v38 = vand.u32 2147483647, %v2038_v22 }
  0xef   : > { %v533_v26 = vadd.s32 1, %v1609_v20  ;;  %v733_v29 = vshrl.u32 %v732_v24, 23  ;;  %v2043_v30 = vand.u32 8388607, %v729_v21  ;;  %v2050_v39 = vshll.u32 %v531_v25, 8 }
  0xf0   : > { %v430_v28 = vadd.s32 1, %v1605_v23  ;;  %v2045_v31 = vpop.f32.mrb[4].mxu0  ;;  %v2054_v41 = vshll.u32 %v428_v27, 8 }
  0xf1   : > { %vm534_vm2 = vcmp.gt.s32.totalorder %v533_v26, 0  ;;  %v2047_v32 = vpop.f32.mrb[5].mxu0  ;;  %v1617_v34 = vadd.s32 4294967169, %v733_v29  ;;  %v737_v42 = vor.u32 8388608, %v2043_v30 }
  0xf2   : > { %v535_v33 = vsel %vm534_vm2, %v533_v26, 0  ;;  %vm431_vm3 = vcmp.gt.s32.totalorder %v430_v28, 0 }
  0xf3   : > { %v536_v35 = vshrl.u32 %v535_v33, 5  ;;  %v537_v36 = vand.u32 31, %v535_v33  ;;  %v432_v37 = vsel %vm431_vm3, %v430_v28, 0  ;;  %v2060_v48 = vadd.s32 1, %v1617_v34 }
  0xf4   : > { %v2052_v40 = vshrl.u32 %v432_v37, 5  ;;  %v2057_v43 = vpop.f32.mrb[6].mxu0  ;;  %v434_v47 = vand.u32 31, %v432_v37 }
  0xf5   : > { %v538_v44 = vsub.s32 32, %v537_v36  ;;  %v540_v46 = vshll.u32 %v2870_v45, %v537_v36  ;;  %v2062_v49 = vpop.f32.mrb[7].mxu0  ;;  %v543_v51 = vshll.u32 %v1958_v50, %v537_v36  ;;  %v546_v53 = vshll.u32 %v1959_v52, %v537_v36 }
  0xf6   : > { %2874 = vst [vmem:[#allocation2_spill] sm:$0xff] %v2062_v49  ;;  %v549_v55 = vshll.u32 %v1960_v54, %v537_v36  ;;  %v552_v57 = vshll.u32 %v1961_v56, %v537_v36  ;;  %vm555_vm4 = vcmp.lt.s32.totalorder %v536_v35, 1  ;;  %vm556_vm5 = vcmp.lt.s32.totalorder %v536_v35, 2 }
  0xf7   : > { %v541_v58 = vshrl.u32 %v1958_v50, %v538_v44  ;;  %v544_v59 = vshrl.u32 %v1959_v52, %v538_v44  ;;  %v547_v60 = vshrl.u32 %v1960_v54, %v538_v44  ;;  %v539_v61 = vshrl.u32 %v2870_v45, %v538_v44 }
  0xf8   : > { %v550_v62 = vshrl.u32 %v1961_v56, %v538_v44  ;;  %v553_v0 = vshrl.u32 %v2869_v63, %v538_v44  ;;  %v435_v4 = vsub.s32 32, %v434_v47  ;;  %vm557_vm6 = vcmp.lt.s32.totalorder %v536_v35, 3 }
  0xf9   : > { %v542_v1 = vor.u32 %v541_v58, %v540_v46  ;;  %v545_v2 = vor.u32 %v544_v59, %v543_v51  ;;  %v548_v3 = vor.u32 %v547_v60, %v546_v53  ;;  %vm558_vm7 = vcmp.lt.s32.totalorder %v536_v35, 4 }
  0xfa   : > { %v551_v5 = vor.u32 %v550_v62, %v549_v55  ;;  %v554_v6 = vor.u32 %v553_v0, %v552_v57  ;;  %v437_v18 = vshll.u32 %v2870_v45, %v434_v47  ;;  %v438_v24 = vshrl.u32 %v1958_v50, %v435_v4 }
  0xfb   : > { %v559_v7 = vsel %vm555_vm4, %v539_v61, %v542_v1  ;;  %v560_v8 = vsel %vm558_vm7, %v548_v3, 2102212464  ;;  %v563_v11 = vsel %vm555_vm4, %v542_v1, %v545_v2  ;;  %v567_v14 = vsel %vm555_vm4, %v545_v2, %v548_v3 }
  0xfc   : > { %v561_v15 = vsel %vm557_vm6, %v545_v2, %v560_v8  ;;  %v564_v16 = vsel %vm558_vm7, %v551_v5, 920167782  ;;  %v568_v17 = vsel %vm558_vm7, %v554_v6, 1326507024  ;;  %v440_v25 = vshll.u32 %v1958_v50, %v434_v47 }
  0xfd   : > { %v565_v20 = vsel %vm557_vm6, %v548_v3, %v564_v16  ;;  %v569_v23 = vsel %vm557_vm6, %v551_v5, %v568_v17  ;;  %v562_v26 = vsel %vm556_vm5, %v559_v7, %v561_v15  ;;  %v441_v29 = vshrl.u32 %v1959_v52, %v435_v4 }
  0xfe   : > { %v566_v27 = vsel %vm556_vm5, %v563_v11, %v565_v20  ;;  %v570_v28 = vsel %vm556_vm5, %v567_v14, %v569_v23  ;;  %v439_v44 = vor.u32 %v438_v24, %v437_v18  ;;  %v443_v51 = vshll.u32 %v1959_v52, %v434_v47 }
  0xff   : > { %v2085_v33 = vmul.u32.u64.low %v2050_v39, %v570_v28  ;;  %v2086_v34 = vmul.u32.u64.high %v2050_v39, %v570_v28, %v2085_v33  ;;  %v2089_v36 = vmul.u32.u64.low %v2050_v39, %v566_v27  ;;  %v2090_v37 = vmul.u32.u64.high %v2050_v39, %v566_v27, %v2089_v36 }
 0x100   : > { %v442_v46 = vor.u32 %v441_v29, %v440_v25  ;;  %v444_v53 = vshrl.u32 %v1960_v54, %v435_v4  ;;  %v436_v55 = vshrl.u32 %v2870_v45, %v435_v4  ;;  %v446_v35 = vshll.u32 %v1960_v54, %v434_v47 }
 0x101   : > { %v447_v57 = vshrl.u32 %v1961_v56, %v435_v4  ;;  %v450_v58 = vshrl.u32 %v2869_v63, %v435_v4  ;;  %v578_v59 = vmul.u32 %v2050_v39, %v562_v26  ;;  %v449_v61 = vshll.u32 %v1961_v56, %v434_v47 }
 0x102   : > { %v445_v60 = vor.u32 %v444_v53, %v443_v51  ;;  %vm452_vm8 = vcmp.lt.s32.totalorder %v2052_v40, 1  ;;  %vm580_vm9 = vc.u32 %v2086_v34, %v2089_v36  ;;  %v581_v62 = vadd.s32 1, %v2090_v37 }
 0x103   : > { %v448_v0 = vor.u32 %v447_v57, %v446_v35  ;;  %vm453_vm10 = vcmp.lt.s32.totalorder %v2052_v40, 2  ;;  %v451_v1 = vor.u32 %v450_v58, %v449_v61  ;;  %vm454_vm11 = vcmp.lt.s32.totalorder %v2052_v40, 3 }
 0x104   : > { %vm455_vm12 = vcmp.lt.s32.totalorder %v2052_v40, 4  ;;  %v460_v2 = vsel %vm452_vm8, %v439_v44, %v442_v46  ;;  %v582_v39 = vsel %vm580_vm9, %v581_v62, %v2090_v37  ;;  %v464_v47 = vsel %vm452_vm8, %v442_v46, %v445_v60 }
 0x105   : > { %v457_v3 = vsel %vm455_vm12, %v445_v60, 2102212464  ;;  %v461_v4 = vsel %vm455_vm12, %v448_v0, 920167782  ;;  %v583_v5 = vadd.s32 %v582_v39, %v578_v59  ;;  %v456_v6 = vsel %vm452_vm8, %v436_v55, %v439_v44 }
 0x106   : > { %v462_v7 = vsel %vm454_vm11, %v445_v60, %v461_v4  ;;  %v465_v8 = vsel %vm455_vm12, %v451_v1, 1326507024  ;;  %v458_v11 = vsel %vm454_vm11, %v442_v46, %v457_v3  ;;  %vm740_vm13 = vcmp.gt.s32.totalorder %v2060_v48, 0 }
 0x107   : > { %v463_v14 = vsel %vm453_vm10, %v460_v2, %v462_v7  ;;  %v466_v15 = vsel %vm454_vm11, %v448_v0, %v465_v8  ;;  %v584_v16 = vadd.s32 536870912, %v583_v5  ;;  %v741_v25 = vsel %vm740_vm13, %v2060_v48, 0 }
 0x108   : > { %v467_v17 = vsel %vm453_vm10, %v464_v47, %v466_v15  ;;  %v2113_v18 = vmul.u32.u64.low %v2054_v41, %v463_v14  ;;  %v2114_v20 = vmul.u32.u64.high %v2054_v41, %v463_v14, %v2113_v18  ;;  %v629_v26 = vand.u32 2139095040, %v2038_v22 }
 0x109   : > { %v2118_v23 = vmul.u32.u64.low %v2054_v41, %v467_v17  ;;  %v2119_v24 = vmul.u32.u64.high %v2054_v41, %v467_v17, %v2118_v23  ;;  %v2123_v27 = vshrl.u32 %v584_v16, 30  ;;  %v459_v28 = vsel %vm453_vm10, %v456_v6, %v458_v11 }
 0x10a   : > { %v743_v29 = vand.u32 31, %v741_v25  ;;  %v478_v37 = vadd.s32 1, %v2114_v20  ;;  %v2131_v46 = vand.u32 8388607, %v626_v38  ;;  %v475_v51 = vmul.u32 %v2054_v41, %v459_v28 }
 0x10b   : > { %v586_v33 = vshll.u32 %v2123_v27, 30  ;;  %vm477_vm14 = vc.u32 %v2119_v24, %v2113_v18  ;;  %v2138_v48 = vshll.u32 %v737_v42, 8  ;;  %v630_v40 = vshrl.u32 %v629_v26, 23 }
 0x10c   : > { %v744_v44 = vsub.s32 32, %v743_v29  ;;  %v579_v53 = vadd.s32 %v2089_v36, %v2086_v34  ;;  %v479_v35 = vsel %vm477_vm14, %v478_v37, %v2114_v20  ;;  %v746_v57 = vshll.u32 %v2870_v45, %v743_v29 }
 0x10d   : > { %v2141_v55 = vsub.s32 %v583_v5, %v586_v33  ;;  %v480_v58 = vadd.s32 %v479_v35, %v475_v51  ;;  %v749_v41 = vshll.u32 %v1958_v50, %v743_v29  ;;  %v742_v42 = vshrl.u32 %v741_v25, 5 }
 0x10e   : > { %v747_v59 = vshrl.u32 %v1958_v50, %v744_v44  ;;  %v750_v60 = vshrl.u32 %v1959_v52, %v744_v44  ;;  %v752_v61 = vshll.u32 %v1959_v52, %v743_v29  ;;  %v753_v34 = vshrl.u32 %v1960_v54, %v744_v44 }
 0x10f   : > { %v589_v30 = vsub.s32 0, %v2141_v55  ;;  %v481_v36 = vadd.s32 536870912, %v480_v58  ;;  %v1613_v1 = vadd.s32 4294967169, %v630_v40  ;;  %v755_v3 = vshll.u32 %v1960_v54, %v743_v29 }
 0x110   : > { %v748_v62 = vor.u32 %v747_v59, %v746_v57  ;;  %v751_v0 = vor.u32 %v750_v60, %v749_v41  ;;  %v754_v39 = vor.u32 %v753_v34, %v752_v61  ;;  %v756_v4 = vshrl.u32 %v1961_v56, %v744_v44 }
 0x111   : > { %v1610_v2 = vmin.u32 %v589_v30, %v2141_v55  ;;  %v2154_v47 = vshrl.u32 %v481_v36, 30  ;;  %v745_v5 = vshrl.u32 %v2870_v45, %v744_v44  ;;  %v758_v6 = vshll.u32 %v1961_v56, %v743_v29 }
 0x112   : > { %v759_v7 = vshrl.u32 %v2869_v63, %v744_v44  ;;  %v757_v11 = vor.u32 %v756_v4, %v755_v3  ;;  %vm761_vm15 = vcmp.lt.s32.totalorder %v742_v42, 1  ;;  %vm764_vm0 = vcmp.lt.s32.totalorder %v742_v42, 4 }
 0x113   : > { %v591_v8 = vclz %v1610_v2  ;;  %v483_v14 = vshll.u32 %v2154_v47, 30  ;;  %vm762_vm1 = vcmp.lt.s32.totalorder %v742_v42, 2  ;;  %v766_v16 = vsel %vm764_vm0, %v754_v39, 2102212464 }
 0x114   : > { %v760_v15 = vor.u32 %v759_v7, %v758_v6  ;;  %vm763_vm2 = vcmp.lt.s32.totalorder %v742_v42, 3  ;;  %v769_v20 = vsel %vm761_vm15, %v748_v62, %v751_v0  ;;  %v770_v23 = vsel %vm764_vm0, %v757_v11, 920167782 }
 0x115   : > { %v1611_v17 = vadd.s32 4294967294, %v591_v8  ;;  %v2162_v25 = vsub.s32 %v480_v58, %v483_v14  ;;  %v765_v26 = vsel %vm761_vm15, %v745_v5, %v748_v62  ;;  %v771_v28 = vsel %vm763_vm2, %v754_v39, %v770_v23 }
 0x116   : > { %v773_v29 = vsel %vm761_vm15, %v751_v0, %v754_v39  ;;  %v767_v33 = vsel %vm763_vm2, %v751_v0, %v766_v16  ;;  %v772_v37 = vsel %vm762_vm1, %v769_v20, %v771_v28  ;;  %v774_v44 = vsel %vm764_vm0, %v760_v15, 1326507024 }
 0x117   : > { %vm1612_vm3 = vcmp.lt.s32.totalorder %v1611_v17, 0  ;;  %v486_v40 = vsub.s32 0, %v2162_v25  ;;  %v775_v35 = vsel %vm763_vm2, %v757_v11, %v774_v44  ;;  %v636_v57 = vadd.s32 1, %v1613_v1 }
 0x118   : > { %v594_v51 = vsel %vm1612_vm3, 0, %v1611_v17  ;;  %v776_v58 = vsel %vm762_vm1, %v773_v29, %v775_v35  ;;  %v2175_v0 = vmul.u32.u64.low %v2138_v48, %v772_v37  ;;  %v2176_v2 = vmul.u32.u64.high %v2138_v48, %v772_v37, %v2175_v0 }
 0x119   : > { %v595_v59 = vsub.s32 32, %v594_v51  ;;  %v596_v41 = vshll.u32 %v2141_v55, %v594_v51  ;;  %v599_v60 = vsub.s32 4294967266, %v594_v51  ;;  %v1606_v30 = vmin.u32 %v486_v40, %v2162_v25 }
 0x11a   : > { %v2171_v61 = vmul.u32.u64.low %v2138_v48, %v776_v58  ;;  %v2172_v34 = vmul.u32.u64.high %v2138_v48, %v776_v58, %v2171_v61  ;;  %vm637_vm4 = vcmp.gt.s32.totalorder %v636_v57, 0  ;;  %v634_v55 = vor.u32 8388608, %v2131_v46 }
 0x11b   : > { %v597_v36 = vshrl.u32 %v579_v53, %v595_v59  ;;  %v600_v62 = vadd.s32 127, %v599_v60  ;;  %v488_v1 = vclz %v1606_v30  ;;  %v638_v39 = vsel %vm637_vm4, %v636_v57, 0 }
 0x11c   : > { %v935_v3 = vand.u32 2147483647, %v2045_v31  ;;  %v768_v6 = vsel %vm762_vm1, %v765_v26, %v767_v33  ;;  %v640_v7 = vand.u32 31, %v638_v39  ;;  %v609_v8 = vsub.s32 4, %v2123_v27 }
 0x11d   : > { %v598_v4 = vor.u32 %v597_v36, %v596_v41  ;;  %v601_v5 = vshll.u32 %v600_v62, 23  ;;  %v1607_v53 = vadd.s32 4294967294, %v488_v1  ;;  %vm786_vm5 = vc.u32 %v2172_v34, %v2175_v0 }
 0x11e   : > { %v938_v11 = vand.u32 2139095040, %v2045_v31  ;;  %v476_v46 = vadd.s32 %v2113_v18, %v2119_v24  ;;  %v787_v15 = vadd.s32 1, %v2176_v2  ;;  %v641_v16 = vsub.s32 32, %v640_v7 }
 0x11f   : > { %v602_v14 = vor.u32 4788187, %v601_v5  ;;  %vm525_vm6 = vcmp.lt.s32.totalorder %v2023_v9, 0  ;;  %vm1608_vm7 = vcmp.lt.s32.totalorder %v1607_v53, 0  ;;  %v784_v42 = vmul.u32 %v2138_v48, %v768_v6 }
 0x120   : > { %v2191_v17 = vshrl.u32 %v638_v39, 5  ;;  %v2193_v20 = vshll.u32 %v634_v55, 8  ;;  %v605_v26 = vcvt.s32.f32 %v598_v4  ;;  %v491_v28 = vsel %vm1608_vm7, 0, %v1607_v53 }
 0x121   : > { %v603_v23 = vand.u32 2147483647, %v602_v14  ;;  %v788_v29 = vsel %vm786_vm5, %v787_v15, %v2176_v2  ;;  %v492_v33 = vsub.s32 32, %v491_v28  ;;  %v496_v37 = vsub.s32 4294967266, %v491_v28 }
 0x122   : > { %v789_v18 = vadd.s32 %v788_v29, %v784_v42  ;;  %v643_v24 = vshll.u32 %v2870_v45, %v640_v7  ;;  %v493_v51 = vshll.u32 %v2162_v25, %v491_v28  ;;  %v644_v40 = vshrl.u32 %v1958_v50, %v641_v16 }
 0x123   : > { %v606_v44 = vmul.f32 %v605_v26, %v603_v23  ;;  %v647_v48 = vshrl.u32 %v1959_v52, %v641_v16  ;;  %v494_v35 = vshrl.u32 %v476_v46, %v492_v33  ;;  %v497_v57 = vadd.s32 127, %v496_v37 }
 0x124   : > { %v790_v59 = vadd.s32 536870912, %v789_v18  ;;  %v650_v41 = vshrl.u32 %v1960_v54, %v641_v16  ;;  %v646_v58 = vshll.u32 %v1958_v50, %v640_v7  ;;  %v649_v30 = vshll.u32 %v1959_v52, %v640_v7 }
 0x125   : > { %v607_v60 = vxor.u32 2147483648, %v606_v44  ;;  %v652_v61 = vshll.u32 %v1960_v54, %v640_v7  ;;  %v495_v36 = vor.u32 %v494_v35, %v493_v51  ;;  %v498_v62 = vshll.u32 %v497_v57, 23 }
 0x126   : > { %v2204_v2 = vshrl.u32 %v790_v59, 30  ;;  %v653_v25 = vshrl.u32 %v1961_v56, %v641_v16  ;;  %v645_v1 = vor.u32 %v644_v40, %v643_v24  ;;  %v648_v55 = vor.u32 %v647_v48, %v646_v58 }
 0x127   : > { %v655_v39 = vshll.u32 %v1961_v56, %v640_v7  ;;  %v656_v4 = vshrl.u32 %v2869_v63, %v641_v16  ;;  %v499_v5 = vor.u32 4788187, %v498_v62  ;;  %v651_v53 = vor.u32 %v650_v41, %v649_v30 }
 0x128   : > { %v792_v6 = vshll.u32 %v2204_v2, 30  ;;  %v939_v14 = vshrl.u32 %v938_v11, 23  ;;  %v608_v46 = vsel %vm525_vm6, %v607_v60, %v606_v44  ;;  %v642_v15 = vshrl.u32 %v2870_v45, %v641_v16 }
 0x129   : > { %v654_v42 = vor.u32 %v653_v25, %v652_v61  ;;  %v657_v23 = vor.u32 %v656_v4, %v655_v39  ;;  %vm422_vm8 = vcmp.lt.s32.totalorder %v2027_v12, 0  ;;  %v500_v26 = vand.u32 2147483647, %v499_v5  ;;  %v1244_v39 = vld [vmem:[%s2249_s8] sm:$0xff] }
 0x12a   : > { %v502_v28 = vcvt.s32.f32 %v495_v36  ;;  %v2214_v29 = vsub.s32 %v789_v18, %v792_v6  ;;  %vm658_vm9 = vcmp.lt.s32.totalorder %v2191_v17, 1  ;;  %vm659_vm10 = vcmp.lt.s32.totalorder %v2191_v17, 2  ;;  %1787 = vmatprep.mubr.f32.mxu1 %v1244_v39 }
 0x12b   : > { %vm660_vm11 = vcmp.lt.s32.totalorder %v2191_v17, 3  ;;  %vm661_vm12 = vcmp.lt.s32.totalorder %v2191_v17, 4  ;;  %v666_v7 = vsel %vm658_vm9, %v645_v1, %v648_v55  ;;  %v670_v18 = vsel %vm658_vm9, %v648_v55, %v651_v53 }
 0x12c   : > { %v503_v11 = vmul.f32 %v502_v28, %v500_v26  ;;  %v795_v16 = vsub.s32 0, %v2214_v29  ;;  %v663_v33 = vsel %vm661_vm12, %v651_v53, 2102212464  ;;  %v667_v37 = vsel %vm661_vm12, %v654_v42, 920167782 }
 0x12d   : > { %v668_v24 = vsel %vm660_vm11, %v651_v53, %v667_v37  ;;  %v671_v44 = vsel %vm661_vm12, %v657_v23, 1326507024  ;;  %v1625_v51 = vadd.s32 4294967169, %v939_v14  ;;  %v662_v48 = vsel %vm658_vm9, %v642_v15, %v645_v1 }
 0x12e   : > { %v1618_v40 = vmin.u32 %v795_v16, %v2214_v29  ;;  %v664_v35 = vsel %vm660_vm11, %v648_v55, %v663_v33  ;;  %v669_v57 = vsel %vm659_vm10, %v666_v7, %v668_v24  ;;  %v504_v59 = vxor.u32 2147483648, %v503_v11 }
 0x12f   : > { %v672_v41 = vsel %vm660_vm11, %v654_v42, %v671_v44  ;;  %v2231_v60 = vmul.u32.u64.low %v2193_v20, %v669_v57  ;;  %v2232_v58 = vmul.u32.u64.high %v2193_v20, %v669_v57, %v2231_v60  ;;  %vm2237_vm13 = vcmp.le.f32.partialorder %v523_v10, 0.7853982 }
 0x130   : > { %v797_v61 = vclz %v1618_v40  ;;  %v673_v36 = vsel %vm659_vm10, %v670_v18, %v672_v41  ;;  %v942_v62 = vand.u32 8388607, %v935_v3  ;;  %v2254_v10 = vsel %vm2237_vm13, %v2023_v9, %v608_v46 }
 0x131   : > { %v2257_v25 = vmul.u32.u64.low %v2193_v20, %v673_v36  ;;  %v2258_v1 = vmul.u32.u64.high %v2193_v20, %v673_v36, %v2257_v25  ;;  %v945_v55 = vadd.s32 1, %v1625_v51  ;;  %v2266_v4 = vsel %vm525_vm6, %v609_v8, %v2123_v27 }
 0x132   : > { %vm2270_vm14 = vcmp.le.f32.partialorder %v420_v13, 0.7853982  ;;  %v1619_v6 = vadd.s32 4294967294, %v797_v61  ;;  %v665_v53 = vsel %vm659_vm10, %v662_v48, %v664_v35  ;;  %v505_v14 = vsel %vm422_vm8, %v504_v59, %v503_v11 }
 0x133   : > { %v684_v46 = vadd.s32 1, %v2232_v58  ;;  %v943_v15 = vor.u32 8388608, %v942_v62  ;;  %vm946_vm15 = vcmp.gt.s32.totalorder %v945_v55, 0  ;;  %1917 = vcosq.f32 %v2254_v10 }
 0x134   : > { %v785_v13 = vadd.s32 %v2175_v0, %v2172_v34  ;;  %vm1620_vm0 = vcmp.lt.s32.totalorder %v1619_v6, 0  ;;  %v947_v27 = vsel %vm946_vm15, %v945_v55, 0  ;;  %v681_v42 = vmul.u32 %v2193_v20, %v665_v53 }
 0x135   : > { %v800_v8 = vsel %vm1620_vm0, 0, %v1619_v6  ;;  %vm683_vm1 = vc.u32 %v2258_v1, %v2231_v60  ;;  %v2285_v17 = vshrl.u32 %v947_v27, 5  ;;  %v2290_v23 = vsel %vm2270_vm14, %v2027_v12, %v505_v14 }
 0x136   : > { %v801_v26 = vsub.s32 32, %v800_v8  ;;  %v805_v28 = vsub.s32 4294967266, %v800_v8  ;;  %v685_v7 = vsel %vm683_vm1, %v684_v46, %v2232_v58  ;;  %v802_v34 = vshll.u32 %v2214_v29, %v800_v8 }
 0x137   : > { %v686_v0 = vadd.s32 %v685_v7, %v681_v42  ;;  %v949_v11 = vand.u32 31, %v947_v27  ;;  %v2294_v16 = vshll.u32 %v943_v15, 8  ;;  %vm967_vm2 = vcmp.lt.s32.totalorder %v2285_v17, 1 }
 0x138   : > { %v803_v20 = vshrl.u32 %v785_v13, %v801_v26  ;;  %v806_v33 = vadd.s32 127, %v805_v28  ;;  %vm969_vm3 = vcmp.lt.s32.totalorder %v2285_v17, 3  ;;  %vm968_vm4 = vcmp.lt.s32.totalorder %v2285_v17, 2 }
 0x139   : > { %v687_v37 = vadd.s32 536870912, %v686_v0  ;;  %v950_v24 = vsub.s32 32, %v949_v11  ;;  %v952_v18 = vshll.u32 %v2870_v45, %v949_v11  ;;  %vm970_vm5 = vcmp.lt.s32.totalorder %v2285_v17, 4 }
 0x13a   : > { %v804_v44 = vor.u32 %v803_v20, %v802_v34  ;;  %v807_v29 = vshll.u32 %v806_v33, 23  ;;  %v955_v51 = vshll.u32 %v1958_v50, %v949_v11  ;;  %v958_v40 = vshll.u32 %v1959_v52, %v949_v11 }
 0x13b   : > { %v2303_v48 = vshrl.u32 %v687_v37, 30  ;;  %v953_v35 = vshrl.u32 %v1958_v50, %v950_v24  ;;  %v956_v57 = vshrl.u32 %v1959_v52, %v950_v24  ;;  %v961_v59 = vshll.u32 %v1960_v54, %v949_v11 }
 0x13c   : > { %vm731_vm6 = vcmp.lt.s32.totalorder %v2035_v19, 0  ;;  %v808_v41 = vor.u32 4788187, %v807_v29  ;;  %v811_v58 = vcvt.s32.f32 %v804_v44  ;;  %v959_v61 = vshrl.u32 %v1960_v54, %v950_v24 }
 0x13d   : > { %v962_v36 = vshrl.u32 %v1961_v56, %v950_v24  ;;  %v689_v62 = vshll.u32 %v2303_v48, 30  ;;  %v954_v25 = vor.u32 %v953_v35, %v952_v18  ;;  %v957_v55 = vor.u32 %v956_v57, %v955_v51  ;;  %v2313_v6 = vpop.eup %1917 }
 0x13e   : > { %v964_v39 = vshll.u32 %v1961_v56, %v949_v11  ;;  %v809_v53 = vand.u32 2147483647, %v808_v41  ;;  %v960_v14 = vor.u32 %v959_v61, %v958_v40  ;;  %v965_v15 = vshrl.u32 %v2869_v63, %v950_v24 }
 0x13f   : > { %v963_v46 = vor.u32 %v962_v36, %v961_v59  ;;  %vm2318_vm7 = vcmp.le.f32.partialorder %v729_v21, 0.7853982  ;;  %v2322_v27 = vsub.s32 %v686_v0, %v689_v62  ;;  %v951_v8 = vshrl.u32 %v2870_v45, %v950_v24 }
 0x140   : > { %v975_v42 = vsel %vm967_vm2, %v954_v25, %v957_v55  ;;  %v835_v26 = vand.u32 2139095040, %v2047_v32  ;;  %v812_v28 = vmul.f32 %v811_v58, %v809_v53  ;;  %v966_v7 = vor.u32 %v965_v15, %v964_v39 }
 0x141   : > { %v972_v34 = vsel %vm970_vm5, %v960_v14, 2102212464  ;;  %v976_v21 = vsel %vm970_vm5, %v963_v46, 920167782  ;;  %v692_v11 = vsub.s32 0, %v2322_v27  ;;  %v971_v0 = vsel %vm967_vm2, %v951_v8, %v954_v25 }
 0x142   : > { %v977_v20 = vsel %vm969_vm3, %v960_v14, %v976_v21  ;;  %v979_v33 = vsel %vm967_vm2, %v957_v55, %v960_v14  ;;  %v813_v37 = vxor.u32 2147483648, %v812_v28  ;;  %v973_v24 = vsel %vm969_vm3, %v957_v55, %v972_v34 }
 0x143   : > { %v978_v18 = vsel %vm968_vm4, %v975_v42, %v977_v20  ;;  %v980_v44 = vsel %vm970_vm5, %v966_v7, 1326507024  ;;  %v1614_v29 = vmin.u32 %v692_v11, %v2322_v27  ;;  %1919 = vsinq.f32 %v2254_v10 }
 0x144   : > { %v981_v51 = vsel %vm969_vm3, %v963_v46, %v980_v44  ;;  %v2349_v40 = vmul.u32.u64.low %v2294_v16, %v978_v18  ;;  %v2350_v35 = vmul.u32.u64.high %v2294_v16, %v978_v18, %v2349_v40  ;;  %v2868_v59 = vand.u32 2147483647, %v2047_v32 }
 0x145   : > { %v982_v57 = vsel %vm968_vm4, %v979_v33, %v981_v51  ;;  %v836_v41 = vshrl.u32 %v835_v26, 23  ;;  %v814_v58 = vsel %vm731_vm6, %v813_v37, %v812_v28  ;;  %v694_v61 = vclz %v1614_v29 }
 0x146   : > { %v2359_v36 = vmul.u32.u64.low %v2294_v16, %v982_v57  ;;  %v2360_v62 = vmul.u32.u64.high %v2294_v16, %v982_v57, %v2359_v36  ;;  %1921 = vcosq.f32 %v2290_v23  ;;  %v974_v25 = vsel %vm968_vm4, %v971_v0, %v973_v24 }
 0x147   : > { %v1621_v10 = vadd.s32 4294967169, %v836_v41  ;;  %v2867_v55 = vand.u32 2147483647, %v2057_v43  ;;  %v612_v39 = vsel %vm2237_vm13, 0, %v2266_v4  ;;  %1923 = vsinq.f32 %v2290_v23 }
 0x148   : > { %v1615_v53 = vadd.s32 4294967294, %v694_v61  ;;  %v993_v14 = vadd.s32 1, %v2350_v35  ;;  %v817_v46 = vsel %vm2318_vm7, %v2035_v19, %v814_v58  ;;  %v682_v17 = vadd.s32 %v2231_v60, %v2258_v1 }
 0x149   : > { %v842_v15 = vadd.s32 1, %v1621_v10  ;;  %v1144_v8 = vand.u32 2139095040, %v2057_v43  ;;  %v990_v42 = vmul.u32 %v2294_v16, %v974_v25  ;;  %vm992_vm10 = vc.u32 %v2360_v62, %v2349_v40 }
 0x14a   : > { %vm1616_vm9 = vcmp.lt.s32.totalorder %v1615_v53, 0  ;;  %v2381_v30 = vand.u32 8388607, %v2868_v59  ;;  %v994_v23 = vsel %vm992_vm10, %v993_v14, %v2350_v35  ;;  %v2386_v26 = vand.u32 8388607, %v2867_v55 }
 0x14b   : > { %v697_v4 = vsel %vm1616_vm9, 0, %v1615_v53  ;;  %vm843_vm11 = vcmp.gt.s32.totalorder %v842_v15, 0  ;;  %1925 = vcosq.f32 %v817_v46  ;;  %v995_v28 = vadd.s32 %v994_v23, %v990_v42 }
 0x14c   : > { %v698_v60 = vsub.s32 32, %v697_v4  ;;  %v702_v1 = vsub.s32 4294967266, %v697_v4  ;;  %v2388_v7 = vand.u32 3, %v612_v39  ;;  %1927 = vsinq.f32 %v817_v46 }
 0x14d   : > { %v844_v16 = vsel %vm843_vm11, %v842_v15, 0  ;;  %v1145_v34 = vshrl.u32 %v1144_v8, 23  ;;  %v699_v21 = vshll.u32 %v2322_v27, %v697_v4  ;;  %v996_v20 = vadd.s32 536870912, %v995_v28  ;;  %v2391_v33 = vpop.eup %1919 }
 0x14e   : > { %v700_v11 = vshrl.u32 %v682_v17, %v698_v60  ;;  %v703_v0 = vadd.s32 127, %v702_v1  ;;  %v2394_v37 = vadd.s32 %v2349_v40, %v2360_v62  ;;  %v840_v24 = vor.u32 8388608, %v2381_v30 }
 0x14f   : > { %v846_v18 = vand.u32 31, %v844_v16  ;;  %v1149_v44 = vor.u32 8388608, %v2386_v26  ;;  %v2398_v35 = vshrl.u32 %v996_v20, 30  ;;  %v845_v57 = vshrl.u32 %v844_v16, 5 }
 0x150   : > { %v701_v29 = vor.u32 %v700_v11, %v699_v21  ;;  %v704_v51 = vshll.u32 %v703_v0, 23  ;;  %v2400_v41 = vpop.eup %1921  ;;  %v1633_v36 = vadd.s32 4294967169, %v1145_v34  ;;  %vm628_vm12 = vcmp.lt.s32.totalorder %v2038_v22, 0 }
 0x151   : > { %v847_v27 = vsub.s32 32, %v846_v18  ;;  %v849_v58 = vshll.u32 %v2870_v45, %v846_v18  ;;  %v852_v61 = vshll.u32 %v1958_v50, %v846_v18  ;;  %v2404_v40 = vpop.eup %1923  ;;  %v998_v10 = vshll.u32 %v2398_v35, 30 }
 0x152   : > { %v705_v62 = vor.u32 4788187, %v704_v51  ;;  %v708_v25 = vcvt.s32.f32 %v701_v29  ;;  %v855_v39 = vshll.u32 %v1959_v52, %v846_v18  ;;  %v858_v17 = vshll.u32 %v1960_v54, %v846_v18 }
 0x153   : > { %v850_v53 = vshrl.u32 %v1958_v50, %v847_v27  ;;  %v853_v14 = vshrl.u32 %v1959_v52, %v847_v27  ;;  %v856_v46 = vshrl.u32 %v1960_v54, %v847_v27  ;;  %v2413_v8 = vsub.s32 %v995_v28, %v998_v10 }
 0x154   : > { %v706_v15 = vand.u32 2147483647, %v705_v62  ;;  %v859_v42 = vshrl.u32 %v1961_v56, %v847_v27  ;;  %v861_v30 = vshll.u32 %v1961_v56, %v846_v18  ;;  %v862_v60 = vshrl.u32 %v2869_v63, %v847_v27 }
 0x155   : > { %v851_v4 = vor.u32 %v850_v53, %v849_v58  ;;  %v854_v23 = vor.u32 %v853_v14, %v852_v61  ;;  %v857_v26 = vor.u32 %v856_v46, %v855_v39  ;;  %v2418_v1 = vpop.eup %1925  ;;  %vm2422_vm13 = vcmp.le.f32.partialorder %v626_v38, 0.7853982 }
 0x156   : > { %v709_v34 = vmul.f32 %v708_v25, %v706_v15  ;;  %v1001_v28 = vsub.s32 0, %v2413_v8  ;;  %v860_v21 = vor.u32 %v859_v42, %v858_v17  ;;  %vm864_vm15 = vcmp.lt.s32.totalorder %v845_v57, 1  ;;  %v2427_v11 = vpop.eup %1927 }
 0x157   : > { %v848_v0 = vshrl.u32 %v2870_v45, %v847_v27  ;;  %v863_v20 = vor.u32 %v862_v60, %v861_v30  ;;  %vm865_vm0 = vcmp.lt.s32.totalorder %v845_v57, 2  ;;  %vm867_vm1 = vcmp.lt.s32.totalorder %v845_v57, 4 }
 0x158   : > { %v710_v18 = vxor.u32 2147483648, %v709_v34  ;;  %v1626_v29 = vmin.u32 %v1001_v28, %v2413_v8  ;;  %v869_v51 = vsel %vm867_vm1, %v857_v26, 2102212464  ;;  %v872_v38 = vsel %vm864_vm15, %v851_v4, %v854_v23 }
 0x159   : > { %vm866_vm2 = vcmp.lt.s32.totalorder %v845_v57, 3  ;;  %v873_v58 = vsel %vm867_vm1, %v860_v21, 920167782  ;;  %v876_v61 = vsel %vm864_vm15, %v854_v23, %v857_v26  ;;  %v877_v62 = vsel %vm867_vm1, %v863_v20, 1326507024 }
 0x15a   : > { %v1003_v25 = vclz %v1626_v29  ;;  %v868_v10 = vsel %vm864_vm15, %v848_v0, %v851_v4  ;;  %v870_v39 = vsel %vm866_vm2, %v854_v23, %v869_v51  ;;  %v874_v53 = vsel %vm866_vm2, %v857_v26, %v873_v58 }
 0x15b   : > { %v875_v14 = vsel %vm865_vm0, %v872_v38, %v874_v53  ;;  %v878_v46 = vsel %vm866_vm2, %v860_v21, %v877_v62  ;;  %v880_v27 = vshll.u32 %v840_v24, 8  ;;  %v2866_v17 = vand.u32 2147483647, %v2062_v49 }
 0x15c   : > { %v711_v15 = vsel %vm628_vm12, %v710_v18, %v709_v34  ;;  %v1627_v42 = vadd.s32 4294967294, %v1003_v25  ;;  %v879_v30 = vsel %vm865_vm0, %v876_v61, %v878_v46  ;;  %v1151_v60 = vadd.s32 1, %v1633_v36 }
 0x15d   : > { %v871_v28 = vsel %vm865_vm0, %v868_v10, %v870_v39  ;;  %v2437_v20 = vmul.u32.u64.low %v880_v27, %v879_v30  ;;  %v2438_v29 = vmul.u32.u64.high %v880_v27, %v879_v30, %v2437_v20  ;;  %v2440_v4 = vshll.u32 %v1149_v44, 8 }
 0x15e   : > { %vm1628_vm3 = vcmp.lt.s32.totalorder %v1627_v42, 0  ;;  %v2442_v23 = vmul.u32.u64.low %v880_v27, %v875_v14  ;;  %v2443_v26 = vmul.u32.u64.high %v880_v27, %v875_v14, %v2442_v23  ;;  %vm1152_vm4 = vcmp.gt.s32.totalorder %v1151_v60, 0 }
 0x15f   : > { %v2449_v24 = vsel %vm2422_vm13, %v2038_v22, %v711_v15  ;;  %v1006_v34 = vsel %vm1628_vm3, 0, %v1627_v42  ;;  %v1153_v36 = vsel %vm1152_vm4, %v1151_v60, 0  ;;  %v1041_v57 = vand.u32 2139095040, %v2062_v49 }
 0x160   : > { %v1007_v21 = vsub.s32 32, %v1006_v34  ;;  %v1011_v0 = vsub.s32 4294967266, %v1006_v34  ;;  %v887_v18 = vmul.u32 %v880_v27, %v871_v28  ;;  %v2452_v44 = vshrl.u32 %v1153_v36, 5 }
 0x161   : > { %v1008_v51 = vshll.u32 %v2413_v8, %v1006_v34  ;;  %vm889_vm5 = vc.u32 %v2438_v29, %v2442_v23  ;;  %v1155_v38 = vand.u32 31, %v1153_v36  ;;  %v2459_v58 = vand.u32 8388607, %v2866_v17 }
 0x162   : > { %v1009_v61 = vshrl.u32 %v2394_v37, %v1007_v21  ;;  %v1012_v62 = vadd.s32 127, %v1011_v0  ;;  %v890_v25 = vadd.s32 1, %v2443_v26  ;;  %v1042_v10 = vshrl.u32 %v1041_v57, 23 }
 0x163   : > { %v1156_v39 = vsub.s32 32, %v1155_v38  ;;  %v1158_v53 = vshll.u32 %v2870_v45, %v1155_v38  ;;  %v1161_v14 = vshll.u32 %v1958_v50, %v1155_v38  ;;  %vm1173_vm9 = vcmp.lt.s32.totalorder %v2452_v44, 1 }
 0x164   : > { %v1010_v8 = vor.u32 %v1009_v61, %v1008_v51  ;;  %v1013_v46 = vshll.u32 %v1012_v62, 23  ;;  %v891_v27 = vsel %vm889_vm5, %v890_v25, %v2443_v26  ;;  %v1164_v15 = vshll.u32 %v1959_v52, %v1155_v38 }
 0x165   : > { %v892_v42 = vadd.s32 %v891_v27, %v887_v18  ;;  %v1159_v37 = vshrl.u32 %v1958_v50, %v1156_v39  ;;  %v1162_v30 = vshrl.u32 %v1959_v52, %v1156_v39  ;;  %v1167_v60 = vshll.u32 %v1960_v54, %v1155_v38 }
 0x166   : > { %v1014_v28 = vor.u32 4788187, %v1013_v46  ;;  %v1017_v20 = vcvt.s32.f32 %v1010_v8  ;;  %v1165_v34 = vshrl.u32 %v1960_v54, %v1156_v39  ;;  %v1168_v36 = vshrl.u32 %v1961_v56, %v1156_v39 }
 0x167   : > { %vm937_vm10 = vcmp.lt.s32.totalorder %v2045_v31, 0  ;;  %v893_v57 = vadd.s32 536870912, %v892_v42  ;;  %v1160_v21 = vor.u32 %v1159_v37, %v1158_v53  ;;  %v1163_v26 = vor.u32 %v1162_v30, %v1161_v14 }
 0x168   : > { %v1170_v0 = vshll.u32 %v1961_v56, %v1155_v38  ;;  %v1015_v18 = vand.u32 2147483647, %v1014_v28  ;;  %v1166_v51 = vor.u32 %v1165_v34, %v1164_v15  ;;  %v1169_v61 = vor.u32 %v1168_v36, %v1167_v60 }
 0x169   : > { %v1171_v62 = vshrl.u32 %v2869_v63, %v1156_v39  ;;  %v2476_v25 = vshrl.u32 %v893_v57, 30  ;;  %v1157_v8 = vshrl.u32 %v2870_v45, %v1156_v39  ;;  %vm1174_vm11 = vcmp.lt.s32.totalorder %v2452_v44, 2 }
 0x16a   : > { %vm1176_vm15 = vcmp.lt.s32.totalorder %v2452_v44, 4  ;;  %vm2483_vm0 = vcmp.le.f32.partialorder %v935_v3, 0.7853982  ;;  %v2883_v53 = vmov 0  ;;  %v1018_v38 = vmul.f32 %v1017_v20, %v1015_v18  ;;  %v1268_v18 = vld [vmem:[%s2863_s4] sm:$0xff] }
 0x16b   : > { %v2884_v53 = vsel %vm2483_vm0, 4294967295, %v2883_v53  ;;  %v1172_v14 = vor.u32 %v1171_v62, %v1170_v0  ;;  %vm1175_vm1 = vcmp.lt.s32.totalorder %v2452_v44, 3  ;;  %v1178_v46 = vsel %vm1176_vm15, %v1166_v51, 2102212464 }
 0x16c   : > { %2885 = vst [vmem:[#allocation3_spill] sm:$0xff] %v2884_v53  ;;  %v895_v27 = vshll.u32 %v2476_v25, 30  ;;  %v1177_v39 = vsel %vm1173_vm9, %v1157_v8, %v1160_v21  ;;  %v1181_v15 = vsel %vm1173_vm9, %v1160_v21, %v1163_v26  ;;  %v1182_v3 = vsel %vm1176_vm15, %v1169_v61, 920167782  ;;  %v1269_v8 = vld [vmem:[%s2863_s4 + $0x8] sm:$0xff] }
 0x16d   : > { %v1019_v37 = vxor.u32 2147483648, %v1018_v38  ;;  %v1179_v30 = vsel %vm1175_vm1, %v1163_v26, %v1178_v46  ;;  %v1183_v60 = vsel %vm1175_vm1, %v1166_v51, %v1182_v3  ;;  %v1185_v28 = vsel %vm1173_vm9, %v1163_v26, %v1166_v51  ;;  %v1252_v26 = vld [vmem:[%s2862_s3] sm:$0xff]  ;;  %v1255_v46 = vld [vmem:[%s2862_s3 + $0x18] sm:$0xff] }
 0x16e   : > { %1929 = vcosq.f32 %v2449_v24  ;;  %v2500_v20 = vsub.s32 %v892_v42, %v895_v27  ;;  %v1184_v34 = vsel %vm1174_vm11, %v1181_v15, %v1183_v60  ;;  %v1186_v36 = vsel %vm1176_vm15, %v1172_v14, 1326507024  ;;  %v1253_v42 = vld [vmem:[%s2862_s3 + $0x8] sm:$0xff]  ;;  %v1254_v14 = vld [vmem:[%s2862_s3 + $0x10] sm:$0xff]  ;;  %v1271_v3 = vld [vmem:[%s2863_s4 + $0x18] sm:$0xff] }
 0x16f   : > { %1931 = vsinq.f32 %v2449_v24  ;;  %v1187_v57 = vsel %vm1175_vm1, %v1169_v61, %v1186_v36  ;;  %v2508_v21 = vmul.u32.u64.low %v2440_v4, %v1184_v34  ;;  %v2509_v0 = vmul.u32.u64.high %v2440_v4, %v1184_v34, %v2508_v21  ;;  %v1270_v15 = vld [vmem:[%s2863_s4 + $0x10] sm:$0xff] }
 0x170   : > { %v898_v24 = vsub.s32 0, %v2500_v20  ;;  %v1180_v51 = vsel %vm1174_vm11, %v1177_v39, %v1179_v30  ;;  %v1188_v61 = vsel %vm1174_vm11, %v1185_v28, %v1187_v57  ;;  %v1629_v62 = vadd.s32 4294967169, %v1042_v10  ;;  %v1257_v28 = vld [vmem:[%s2862_s3 + $0x28] sm:$0xff] }
 0x171   : > { %v1020_v27 = vsel %vm937_vm10, %v1019_v37, %v1018_v38  ;;  %v2538_v39 = vmul.u32.u64.low %v2440_v4, %v1188_v61  ;;  %v2539_v44 = vmul.u32.u64.high %v2440_v4, %v1188_v61, %v2538_v39  ;;  %v1046_v10 = vor.u32 8388608, %v2459_v58  ;;  %v1256_v58 = vld [vmem:[%s2862_s3 + $0x20] sm:$0xff] }
 0x172   : > { %v2550_v30 = vadd.s32 %v2442_v23, %v2438_v29  ;;  %v1622_v38 = vmin.u32 %v898_v24, %v2500_v20  ;;  %v1048_v37 = vadd.s32 1, %v1629_v62  ;;  %v1831_v60 = vpack.c.bf16 %v1253_v42, %v1252_v26  ;;  %v1272_v29 = vld [vmem:[%s2863_s4 + $0x20] sm:$0xff]  ;;  %v1273_v23 = vld [vmem:[%s2863_s4 + $0x28] sm:$0xff]  ;;  %v1258_v26 = vld [vmem:[%s2862_s3 + $0x30] sm:$0xff] }
 0x173   : > { %v1196_v34 = vmul.u32 %v2440_v4, %v1180_v51  ;;  %v1199_v36 = vadd.s32 1, %v2509_v0  ;;  %v1799_v57 = vpack.c.bf16 %v1269_v8, %v1268_v18  ;;  %v1835_v61 = vpack.c.bf16 %v1255_v46, %v1254_v14  ;;  %v1259_v24 = vld [vmem:[%s2862_s3 + $0x38] sm:$0xff]  ;;  %v1274_v51 = vld [vmem:[%s2863_s4 + $0x30] sm:$0xff]  ;;  %v1261_v39 = vld [vmem:[%s2862_s3 + $0x48] sm:$0xff] }
 0x174   : > { %v2573_v4 = vsel %vm2483_vm0, %v2045_v31, %v1020_v27  ;;  %v900_v42 = vclz %v1622_v38  ;;  %vm1049_vm2 = vcmp.gt.s32.totalorder %v1048_v37, 0  ;;  %1832 = vmatprep.subr.bf16.mxu1 %v1831_v60  ;;  %v1803_v18 = vpack.c.bf16 %v1271_v3, %v1270_v15  ;;  %v1275_v62 = vld [vmem:[%s2863_s4 + $0x38] sm:$0xff]  ;;  %v1260_v27 = vld [vmem:[%s2862_s3 + $0x40] sm:$0xff] }
 0x175   : > { %vm1198_vm3 = vc.u32 %v2539_v44, %v2508_v21  ;;  %v1050_v8 = vsel %vm1049_vm2, %v1048_v37, 0  ;;  %v2586_v14 = vshll.u32 %v1046_v10, 8  ;;  %1800 = vmatprep.subr.bf16.mxu0 %v1799_v57  ;;  %1834 = vmatpush3.bf16.msra.mxu1 %v1831_v60  ;;  %v1839_v46 = vpack.c.bf16 %v1257_v28, %v1256_v58 }
 0x176   : > { %v1623_v15 = vadd.s32 4294967294, %v900_v42  ;;  %v1200_v3 = vsel %vm1198_vm3, %v1199_v36, %v2509_v0  ;;  %v1052_v38 = vand.u32 31, %v1050_v8  ;;  %1802 = vmatpush3.bf16.msra.mxu0 %v1799_v57  ;;  %1836 = vmatprep.subr.bf16.mxu1 %v1835_v61  ;;  %v1807_v37 = vpack.c.bf16 %v1273_v23, %v1272_v29 }
 0x177   : > { %v1201_v10 = vadd.s32 %v1200_v3, %v1196_v34  ;;  %v2595_v17 = vshrl.u32 %v1050_v8, 5  ;;  %1804 = vmatprep.subr.bf16.mxu0 %v1803_v18  ;;  %v1843_v60 = vpack.c.bf16 %v1259_v24, %v1258_v26  ;;  %v1811_v58 = vpack.c.bf16 %v1275_v62, %v1274_v51 }
 0x178   : > { %v2597_v28 = vpop.eup %1929  ;;  %vm1624_vm4 = vcmp.lt.s32.totalorder %v1623_v15, 0  ;;  %v1053_v55 = vsub.s32 32, %v1052_v38  ;;  %v1055_v59 = vshll.u32 %v2870_v45, %v1052_v38  ;;  %v2600_v63 = vpack.c.bf16 %v1261_v39, %v1260_v27 }
 0x179   : > { %v2602_v42 = vpop.eup %1931  ;;  %v903_v0 = vsel %vm1624_vm4, 0, %v1623_v15  ;;  %v1202_v36 = vadd.s32 536870912, %v1201_v10  ;;  %v1058_v57 = vshll.u32 %v1958_v50, %v1052_v38  ;;  %v1061_v34 = vshll.u32 %v1959_v52, %v1052_v38  ;;  %1838 = vmatpush3.bf16.msra.mxu1 %v1835_v61 }
 0x17a   : > { %v904_v29 = vsub.s32 32, %v903_v0  ;;  %v905_v23 = vshll.u32 %v2500_v20, %v903_v0  ;;  %v908_v26 = vsub.s32 4294967266, %v903_v0  ;;  %v1064_v24 = vshll.u32 %v1960_v54, %v1052_v38  ;;  %1806 = vmatpush3.bf16.msra.mxu0 %v1803_v18  ;;  %1840 = vmatprep.subr.bf16.mxu1 %v1839_v46 }
 0x17b   : > { %v2608_v51 = vshrl.u32 %v1202_v36, 30  ;;  %v1056_v62 = vshrl.u32 %v1958_v50, %v1053_v55  ;;  %v1059_v8 = vshrl.u32 %v1959_v52, %v1053_v55  ;;  %v1062_v27 = vshrl.u32 %v1960_v54, %v1053_v55  ;;  %1808 = vmatprep.subr.bf16.mxu0 %v1807_v37 }
 0x17c   : > { %v906_v39 = vshrl.u32 %v2550_v30, %v904_v29  ;;  %v909_v61 = vadd.s32 127, %v908_v26  ;;  %v1065_v15 = vshrl.u32 %v1961_v56, %v1053_v55  ;;  %v1067_v20 = vshll.u32 %v1961_v56, %v1052_v38 }
 0x17d   : > { %v1204_v3 = vshll.u32 %v2608_v51, 30  ;;  %v1057_v18 = vor.u32 %v1056_v62, %v1055_v59  ;;  %v1060_v0 = vor.u32 %v1059_v8, %v1058_v57  ;;  %v1063_v36 = vor.u32 %v1062_v27, %v1061_v34  ;;  %1842 = vmatpush3.bf16.msra.mxu1 %v1839_v46  ;;  %v1262_v27 = vld [vmem:[%s2862_s3 + $0x50] sm:$0xff] }
 0x17e   : > { %v907_v45 = vor.u32 %v906_v39, %v905_v23  ;;  %v910_v50 = vshll.u32 %v909_v61, 23  ;;  %v1066_v49 = vor.u32 %v1065_v15, %v1064_v24  ;;  %v2886_v52 = vmov 1326507024   ;;  %1810 = vmatpush3.bf16.msra.mxu0 %v1807_v37  ;;  %1844 = vmatprep.subr.bf16.mxu1 %v1843_v60  ;;  %v1276_v24 = vld [vmem:[%s2863_s4 + $0x40] sm:$0xff]  ;;  %v1263_v39 = vld [vmem:[%s2862_s3 + $0x58] sm:$0xff]  ;;  %v1278_v61 = vld [vmem:[%s2863_s4 + $0x50] sm:$0xff] }
 0x17f   : > { %v1068_v53 = vshrl.u32 %v2886_v52, %v1053_v55  ;;  %vm834_vm5 = vcmp.lt.s32.totalorder %v2047_v32, 0  ;;  %v2619_v54 = vsub.s32 %v1201_v10, %v1204_v3  ;;  %v2887_v30 = vmov 683565275   ;;  %1812 = vmatprep.subr.bf16.mxu0 %v1811_v58 }
 0x180   : > { %v1054_v29 = vshrl.u32 %v2887_v30, %v1053_v55  ;;  %vm1070_vm9 = vcmp.lt.s32.totalorder %v2595_v17, 1  ;;  %vm1072_vm11 = vcmp.lt.s32.totalorder %v2595_v17, 3  ;;  %v2888_v56 = vand.u32 2147483647, %v2047_v32 }
 0x181   : > { %v911_v46 = vor.u32 4788187, %v910_v50  ;;  %v914_v38 = vcvt.s32.f32 %v907_v45  ;;  %v1069_v37 = vor.u32 %v1068_v53, %v1067_v20  ;;  %vm1073_vm1 = vcmp.lt.s32.totalorder %v2595_v17, 4  ;;  %1846 = vmatpush3.bf16.msra.mxu1 %v1843_v60  ;;  %v1277_v60 = vld [vmem:[%s2863_s4 + $0x48] sm:$0xff] }
 0x182   : > { %vm2626_vm15 = vcmp.le.f32.partialorder %v2888_v56, 0.7853982  ;;  %v1207_v10 = vsub.s32 0, %v2619_v54  ;;  %v1074_v55 = vsel %vm1070_vm9, %v1054_v29, %v1057_v18  ;;  %v1075_v57 = vsel %vm1073_vm1, %v1063_v36, 2102212464  ;;  %1814 = vmatpush3.bf16.msra.mxu0 %v1811_v58  ;;  %1848 = vmatprep.subr.bf16.mxu1 %v2600_v63  ;;  %v1265_v50 = vld [vmem:[%s2862_s3 + $0x68] sm:$0xff] }
 0x183   : > { %v1078_v34 = vsel %vm1070_vm9, %v1057_v18, %v1060_v0  ;;  %v912_v23 = vand.u32 2147483647, %v911_v46  ;;  %v1076_v26 = vsel %vm1072_vm11, %v1060_v0, %v1075_v57  ;;  %v1079_v45 = vsel %vm1073_vm1, %v1066_v49, 920167782 }
 0x184   : > { %v1082_v53 = vsel %vm1070_vm9, %v1060_v0, %v1063_v36  ;;  %v1634_v62 = vmin.u32 %v1207_v10, %v2619_v54  ;;  %vm1071_vm2 = vcmp.lt.s32.totalorder %v2595_v17, 2  ;;  %v1080_v8 = vsel %vm1072_vm11, %v1063_v36, %v1079_v45  ;;  %v1279_v0 = vld [vmem:[%s2863_s4 + $0x58] sm:$0xff]  ;;  %v1264_v36 = vld [vmem:[%s2862_s3 + $0x60] sm:$0xff] }
 0x185   : > { %v1083_v58 = vsel %vm1073_vm1, %v1069_v37, 1326507024  ;;  %v915_v15 = vmul.f32 %v914_v38, %v912_v23  ;;  %v1077_v20 = vsel %vm1071_vm2, %v1074_v55, %v1076_v26  ;;  %v1081_v3 = vsel %vm1071_vm2, %v1078_v34, %v1080_v8  ;;  %1850 = vmatpush3.bf16.msra.mxu1 %v2600_v63  ;;  %v1280_v37 = vld [vmem:[%s2863_s4 + $0x60] sm:$0xff]  ;;  %v1281_v23 = vld [vmem:[%s2863_s4 + $0x68] sm:$0xff]  ;;  %v1266_v63 = vld [vmem:[%s2862_s3 + $0x70] sm:$0xff] }
 0x186   : > { %v1084_v18 = vsel %vm1072_vm11, %v1066_v49, %v1083_v58  ;;  %v1209_v52 = vclz %v1634_v62  ;;  %v2678_v29 = vmul.u32.u64.low %v2586_v14, %v1081_v3  ;;  %v2679_v56 = vmul.u32.u64.high %v2586_v14, %v1081_v3, %v2678_v29  ;;  %v1267_v26 = vld [vmem:[%s2862_s3 + $0x78] sm:$0xff] }
 0x187   : > { %v1085_v30 = vsel %vm1071_vm2, %v1082_v53, %v1084_v18  ;;  %v916_v49 = vxor.u32 2147483648, %v915_v15  ;;  %v1815_v38 = vpack.c.bf16 %v1277_v60, %v1276_v24  ;;  %v1851_v55 = vpack.c.bf16 %v1263_v39, %v1262_v27  ;;  %v1282_v60 = vld [vmem:[%s2863_s4 + $0x70] sm:$0xff]  ;;  %v1283_v62 = vld [vmem:[%s2863_s4 + $0x78] sm:$0xff] }
 0x188   : > { %v2684_v17 = vmul.u32.u64.low %v2586_v14, %v1085_v30  ;;  %v2685_v46 = vmul.u32.u64.high %v2586_v14, %v1085_v30, %v2684_v17  ;;  %v1635_v10 = vadd.s32 4294967294, %v1209_v52  ;;  %v1819_v57 = vpack.c.bf16 %v1279_v0, %v1278_v61 }
 0x189   : > { %v1855_v34 = vpack.c.bf16 %v1265_v50, %v1264_v36  ;;  %1933 = vcosq.f32 %v2573_v4  ;;  %v917_v45 = vsel %vm834_vm5, %v916_v49, %v915_v15  ;;  %v1197_v53 = vadd.s32 %v2508_v21, %v2539_v44  ;;  %1816 = vmatprep.subr.bf16.mxu0 %v1815_v38  ;;  %1852 = vmatprep.subr.bf16.mxu1 %v1851_v55 }
 0x18a   : > { %v1093_v24 = vmul.u32 %v2586_v14, %v1077_v20  ;;  %v920_v8 = vsel %vm2626_vm15, %v2047_v32, %v917_v45  ;;  %vm1636_vm3 = vcmp.lt.s32.totalorder %v1635_v10, 0  ;;  %v1096_v58 = vadd.s32 1, %v2679_v56  ;;  %1818 = vmatpush3.bf16.msra.mxu0 %v1815_v38  ;;  %1854 = vmatpush3.bf16.msra.mxu1 %v1851_v55 }
 0x18b   : > { %v506_v21 = vsub.s32 4, %v2154_v47  ;;  %v1212_v44 = vsel %vm1636_vm3, 0, %v1635_v10  ;;  %vm1095_vm4 = vc.u32 %v2685_v46, %v2678_v29  ;;  %1820 = vmatprep.subr.bf16.mxu0 %v1819_v57  ;;  %v1823_v14 = vpack.c.bf16 %v1281_v23, %v1280_v37  ;;  %1856 = vmatprep.subr.bf16.mxu1 %v1855_v34 }
 0x18c   : > { %v1859_v27 = vpack.c.bf16 %v1267_v26, %v1266_v63  ;;  %1935 = vcosq.f32 %v920_v8  ;;  %v1213_v39 = vsub.s32 32, %v1212_v44  ;;  %v1217_v61 = vsub.s32 4294967266, %v1212_v44 }
 0x18d   : > { %v1827_v15 = vpack.c.bf16 %v1283_v62, %v1282_v60  ;;  %vm512_vm9 = vweird.f32 %v2027_v12  ;;  %v1214_v20 = vshll.u32 %v2619_v54, %v1212_v44  ;;  %v1097_v3 = vsel %vm1095_vm4, %v1096_v58, %v2679_v56  ;;  %v1246_v62 = vld [vmem:[%s2249_s8 + $0x10] sm:$0xff] }
 0x18e   : > { %v507_v18 = vsel %vm422_vm8, %v506_v21, %v2154_v47  ;;  %v516_v0 = vxor.u32 2147483648, %v2404_v40  ;;  %v1215_v36 = vshrl.u32 %v1197_v53, %v1213_v39  ;;  %v1218_v50 = vadd.s32 127, %v1217_v61  ;;  %1822 = vmatpush3.bf16.msra.mxu0 %v1819_v57  ;;  %1858 = vmatpush3.bf16.msra.mxu1 %v1855_v34 }
 0x18f   : > { %v1098_v52 = vadd.s32 %v1097_v3, %v1093_v24  ;;  %v509_v30 = vsel %vm2270_vm14, 0, %v507_v18  ;;  %1937 = vsinq.f32 %v920_v8  ;;  %1824 = vmatprep.subr.bf16.mxu0 %v1823_v14  ;;  %v519_v54 = vxor.u32 2147483648, %v2400_v41  ;;  %1860 = vmatprep.subr.bf16.mxu1 %v1859_v27  ;;  %v1245_v24 = vld [vmem:[%s2249_s8 + $0x8] sm:$0xff] }
 0x190   : > { %v513_v49 = vand.u32 3, %v509_v30  ;;  %v619_v56 = vxor.u32 2147483648, %v2391_v33  ;;  %v1216_v17 = vor.u32 %v1215_v36, %v1214_v20  ;;  %v1219_v38 = vshll.u32 %v1218_v50, 23 }
 0x191   : > { %v1099_v47 = vadd.s32 536870912, %v1098_v52  ;;  %vm617_vm8 = vcmp.lt.s32.totalorder %v2388_v7, 2  ;;  %vm618_vm2 = vcmp.eq.s32.totalorder %v2388_v7, 0  ;;  %vm621_vm14 = vcmp.eq.s32.totalorder %v2388_v7, 2  ;;  %v1247_v7 = vld [vmem:[%s2249_s8 + $0x18] sm:$0xff] }
 0x192   : > { %vm514_vm11 = vcmp.lt.s32.totalorder %v513_v49, 2  ;;  %vm515_vm1 = vcmp.eq.s32.totalorder %v513_v49, 0  ;;  %v1220_v5 = vor.u32 4788187, %v1219_v38  ;;  %1826 = vmatpush3.bf16.msra.mxu0 %v1823_v14  ;;  %vm518_vm3 = vcmp.eq.s32.totalorder %v513_v49, 2  ;;  %1862 = vmatpush3.bf16.msra.mxu1 %v1859_v27 }
 0x193   : > { %v2732_v37 = vshrl.u32 %v1099_v47, 30  ;;  %v517_v10 = vsel %vm515_vm1, %v2400_v41, %v516_v0  ;;  %v2735_v55 = vpop.eup %1933  ;;  %1828 = vmatprep.subr.bf16.mxu0 %v1827_v15  ;;  %v520_v57 = vsel %vm518_vm3, %v519_v54, %v2404_v40  ;;  %v620_v34 = vsel %vm618_vm2, %v2313_v6, %v619_v56  ;;  %v1250_v56 = vld [vmem:[%s2249_s8 + $0x30] sm:$0xff] }
 0x194   : > { %v622_v23 = vxor.u32 2147483648, %v2313_v6  ;;  %v712_v63 = vsub.s32 4, %v2303_v48  ;;  %v1221_v26 = vand.u32 2147483647, %v1220_v5  ;;  %v1223_v45 = vcvt.s32.f32 %v1216_v17 }
 0x195   : > { %v1101_v53 = vshll.u32 %v2732_v37, 30  ;;  %v521_v41 = vsel %vm514_vm11, %v517_v10, %v520_v57  ;;  %v722_v8 = vxor.u32 2147483648, %v2602_v42  ;;  %v725_v44 = vxor.u32 2147483648, %v2597_v28  ;;  %1788 = vmatmul.mubr.f32.vlgmr.msra.gmra.mrb[0].mxu1 %v1245_v24 }
 0x196   : > { %v522_v60 = vsel %vm512_vm9, nan, %v521_v41  ;;  %v623_v40 = vsel %vm621_vm14, %v622_v23, %v2391_v33  ;;  %v713_v6 = vsel %vm628_vm12, %v712_v63, %v2303_v48  ;;  %v2754_v58 = vpop.eup %1935  ;;  %1830 = vmatpush3.bf16.msra.mxu0 %v1827_v15  ;;  %1939 = vsinq.f32 %v2573_v4  ;;  %1790 = vmatprep.mubr.f32.mxu1 %v1246_v62  ;;  %v1248_v15 = vld [vmem:[%s2249_s8 + $0x20] sm:$0xff] }
 0x197   : > { %v2756_v21 = vsub.s32 %v1098_v52, %v1101_v53  ;;  %1743 = vmatprep.mubr.f32.mxu0 %v522_v60  ;;  %v624_v12 = vsel %vm617_vm8, %v620_v34, %v623_v40  ;;  %v715_v33 = vsel %vm2422_vm13, 0, %v713_v6  ;;  %vm615_vm12 = vweird.f32 %v2023_v9  ;;  %v1251_v34 = vld [vmem:[%s2249_s8 + $0x38] sm:$0xff] }
 0x198   : > { %v719_v48 = vand.u32 3, %v715_v33  ;;  %v815_v14 = vsub.s32 4, %v2204_v2  ;;  %v1224_v27 = vmul.f32 %v1223_v45, %v1221_v26  ;;  %v625_v61 = vsel %vm615_vm12, nan, %v624_v12 }
 0x199   : > { %v1104_v39 = vsub.s32 0, %v2756_v21  ;;  %vm718_vm4 = vweird.f32 %v2038_v22  ;;  %v1938_v16 = vpop.eup %1937  ;;  %1744 = vmatmul.mubr.f32.vlgmr.msra.gmra.mrb[8].mxu0 %v625_v61  ;;  %v825_v9 = vxor.u32 2147483648, %v2427_v11  ;;  %1791 = vmatmul.mubr.f32.gmra.mrb[2].mxu1 %v1247_v7  ;;  %v828_v50 = vxor.u32 2147483648, %v2418_v1 }
 0x19a   : > { %vm721_vm13 = vcmp.eq.s32.totalorder %v719_v48, 0  ;;  %vm724_vm9 = vcmp.eq.s32.totalorder %v719_v48, 2  ;;  %v816_v4 = vsel %vm731_vm6, %v815_v14, %v2204_v2  ;;  %vm720_vm8 = vcmp.lt.s32.totalorder %v719_v48, 2  ;;  %1793 = vmatprep.mubr.f32.mxu1 %v1248_v15 }
 0x19b   : > { %v1630_v20 = vmin.u32 %v1104_v39, %v2756_v21  ;;  %v723_v3 = vsel %vm721_vm13, %v2597_v28, %v722_v8  ;;  %v726_v18 = vsel %vm724_vm9, %v725_v44, %v2602_v42  ;;  %v818_v36 = vsel %vm2318_vm7, 0, %v816_v4  ;;  %v1249_v28 = vld [vmem:[%s2249_s8 + $0x28] sm:$0xff] }
 0x19c   : > { %v727_v0 = vsel %vm720_vm8, %v723_v3, %v726_v18  ;;  %v918_v2 = vsub.s32 4, %v2476_v25  ;;  %vm1143_vm6 = vcmp.lt.s32.totalorder %v2057_v43, 0  ;;  %v822_v49 = vand.u32 3, %v818_v36 }
 0x19d   : > { %v1106_v52 = vclz %v1630_v20  ;;  %v728_v30 = vsel %vm718_vm4, nan, %v727_v0  ;;  %v1225_v42 = vxor.u32 2147483648, %v1224_v27  ;;  %vm821_vm11 = vweird.f32 %v2035_v19  ;;  %1794 = vmatmul.mubr.f32.gmra.mrb[4].mxu1 %v1249_v28  ;;  %v2895_v20 = vld [vmem:[#allocation2_spill] sm:$0xff] }
 0x19e   : > { %1746 = vmatprep.mubr.f32.mxu0 %v728_v30  ;;  %v919_v13 = vsel %vm834_vm5, %v918_v2, %v2476_v25  ;;  %v928_v54 = vxor.u32 2147483648, %v1938_v16  ;;  %vm823_vm7 = vcmp.lt.s32.totalorder %v822_v49, 2  ;;  %vm824_vm1 = vcmp.eq.s32.totalorder %v822_v49, 0  ;;  %1796 = vmatprep.mubr.f32.mxu1 %v1250_v56 }
 0x19f   : > { %v1631_v17 = vadd.s32 4294967294, %v1106_v52  ;;  %vm827_vm2 = vcmp.eq.s32.totalorder %v822_v49, 2  ;;  %v826_v22 = vsel %vm824_vm1, %v2418_v1, %v825_v9  ;;  %v921_v47 = vsel %vm2626_vm15, 0, %v919_v13 }
 0x1a0   : > { %v829_v38 = vsel %vm827_vm2, %v828_v50, %v2427_v11  ;;  %v931_v5 = vxor.u32 2147483648, %v2754_v58  ;;  %v925_v25 = vand.u32 3, %v921_v47  ;;  %v1021_v57 = vsub.s32 4, %v2398_v35  ;;  %v1940_v23 = vpop.eup %1939 }
 0x1a1   : > { %vm1632_vm14 = vcmp.lt.s32.totalorder %v1631_v17, 0  ;;  %v830_v10 = vsel %vm823_vm7, %v826_v22, %v829_v38  ;;  %v1226_v63 = vsel %vm1143_vm6, %v1225_v42, %v1224_v27  ;;  %v1094_v1 = vadd.s32 %v2678_v29, %v2685_v46  ;;  %1797 = vmatmul.mubr.f32.gmra.mrb[6].mxu1 %v1251_v34 }
 0x1a2   : > { %v1109_v11 = vsel %vm1632_vm14, 0, %v1631_v17  ;;  %v831_v59 = vsel %vm821_vm11, nan, %v830_v10  ;;  %vm924_vm5 = vweird.f32 %v2047_v32  ;;  %vm926_vm15 = vcmp.lt.s32.totalorder %v925_v25, 2 }
 0x1a3   : > { %v1110_v26 = vsub.s32 32, %v1109_v11  ;;  %v1111_v45 = vshll.u32 %v2756_v21, %v1109_v11  ;;  %v1114_v53 = vsub.s32 4294967266, %v1109_v11  ;;  %1747 = vmatmul.mubr.f32.gmra.mrb[10].mxu0 %v831_v59  ;;  %vm927_vm3 = vcmp.eq.s32.totalorder %v925_v25, 0 }
 0x1a4   : > { %vm930_vm12 = vcmp.eq.s32.totalorder %v925_v25, 2  ;;  %v1022_v41 = vsel %vm937_vm10, %v1021_v57, %v2398_v35  ;;  %v929_v19 = vsel %vm927_vm3, %v2754_v58, %v928_v54  ;;  %v1031_v6 = vxor.u32 2147483648, %v1940_v23 }
 0x1a5   : > { %v1112_v29 = vshrl.u32 %v1094_v1, %v1110_v26  ;;  %v1115_v46 = vadd.s32 127, %v1114_v53  ;;  %v932_v24 = vsel %vm930_vm12, %v931_v5, %v1938_v16  ;;  %v1024_v62 = vsel %vm2483_vm0, 0, %v1022_v41  ;;  %v1637_v1 = vld [vmem:[%s2864_s5] ss:$0 sm:$0xff] }
 0x1a6   : > { %v933_v60 = vsel %vm926_vm15, %v929_v19, %v932_v24  ;;  %v1034_v8 = vxor.u32 2147483648, %v2735_v55  ;;  %v1028_v44 = vand.u32 3, %v1024_v62  ;;  %v2892_v35 = vand.u32 2147483647, %v2057_v43 }
 0x1a7   : > { %v1113_v21 = vor.u32 %v1112_v29, %v1111_v45  ;;  %v1116_v12 = vshll.u32 %v1115_v46, 23  ;;  %v934_v33 = vsel %vm924_vm5, nan, %v933_v60  ;;  %vm1027_vm9 = vweird.f32 %v2045_v31 }
 0x1a8   : > { %vm2816_vm10 = vcmp.le.f32.partialorder %v2892_v35, 0.7853982  ;;  %1749 = vmatprep.mubr.f32.mxu0 %v934_v33  ;;  %vm1030_vm0 = vcmp.eq.s32.totalorder %v1028_v44, 0  ;;  %vm1033_vm4 = vcmp.eq.s32.totalorder %v1028_v44, 2  ;;  %vm1029_vm13 = vcmp.lt.s32.totalorder %v1028_v44, 2 }
 0x1a9   : > { %v1229_v58 = vsel %vm2816_vm10, %v2057_v43, %v1226_v63  ;;  %v1117_v14 = vor.u32 4788187, %v1116_v12  ;;  %v1032_v27 = vsel %vm1030_vm0, %v2735_v55, %v1031_v6  ;;  %v1120_v32 = vcvt.s32.f32 %v1113_v21 }
 0x1aa   : > { %v1035_v61 = vsel %vm1033_vm4, %v1034_v8, %v1940_v23  ;;  %1941 = vcosq.f32 %v1229_v58  ;;  %v1227_v15 = vsub.s32 4, %v2608_v51  ;;  %vm1040_vm8 = vcmp.lt.s32.totalorder %v2895_v20, 0 }
 0x1ab   : > { %v1118_v39 = vand.u32 2147483647, %v1117_v14  ;;  %v1036_v7 = vsel %vm1029_vm13, %v1032_v27, %v1035_v61  ;;  %1943 = vsinq.f32 %v1229_v58  ;;  %v2896_v55 = vand.u32 2147483647, %v2895_v20 }
 0x1ac   : > { %v1037_v4 = vsel %vm1027_vm9, nan, %v1036_v7  ;;  %v1124_v18 = vsub.s32 4, %v2732_v37  ;;  %v1228_v31 = vsel %vm1143_vm6, %v1227_v15, %v2608_v51  ;;  %vm1130_vm15 = vweird.f32 %v2895_v20 }
 0x1ad   : > { %v1121_v16 = vmul.f32 %v1120_v32, %v1118_v39  ;;  %1750 = vmatmul.mubr.f32.gmra.mrb[12].mxu0 %v1037_v4  ;;  %vm1039_vm11 = vcmp.le.f32.partialorder %v2896_v55, 0.7853982  ;;  %v1230_v2 = vsel %vm2816_vm10, 0, %v1228_v31  ;;  %vm1233_vm3 = vweird.f32 %v2057_v43 }
 0x1ae   : > { %v1125_v36 = vsel %vm1040_vm8, %v1124_v18, %v2732_v37  ;;  %v1234_v49 = vand.u32 3, %v1230_v2 }
 0x1af   : > { %v1122_v9 = vxor.u32 2147483648, %v1121_v16  ;;  %v1127_v30 = vsel %vm1039_vm11, 0, %v1125_v36 }
 0x1b0   : > { %v1131_v13 = vand.u32 3, %v1127_v30  ;;  %vm1236_vm7 = vcmp.eq.s32.totalorder %v1234_v49, 0  ;;  %vm1239_vm1 = vcmp.eq.s32.totalorder %v1234_v49, 2  ;;  %vm1235_vm14 = vcmp.lt.s32.totalorder %v1234_v49, 2 }
 0x1b1   : > { %v1123_v3 = vsel %vm1040_vm8, %v1122_v9, %v1121_v16 }
 0x1b2   : > { %v1126_v0 = vsel %vm1039_vm11, %v2895_v20, %v1123_v3  ;;  %vm1136_vm6 = vcmp.eq.s32.totalorder %v1131_v13, 2  ;;  %vm1133_vm2 = vcmp.eq.s32.totalorder %v1131_v13, 0  ;;  %vm1132_vm5 = vcmp.lt.s32.totalorder %v1131_v13, 2 }
 0x1b3   : > { %1945 = vcosq.f32 %v1126_v0 }
 0x1b4   : > { %1947 = vsinq.f32 %v1126_v0  ;;  %v1942_v50 = vpop.eup %1941 }
 0x1b5   : > { %v1944_v52 = vpop.eup %1943  ;;  %v1240_v42 = vxor.u32 2147483648, %v1942_v50 }
 0x1b6   : > { %v1237_v28 = vxor.u32 2147483648, %v1944_v52 }
 0x1b7   : > { %v1241_v51 = vsel %vm1239_vm1, %v1240_v42, %v1944_v52 }
 0x1b8   : > { %v1238_v22 = vsel %vm1236_vm7, %v1942_v50, %v1237_v28 }
 0x1b9   : > { %v1242_v5 = vsel %vm1235_vm14, %v1238_v22, %v1241_v51 }
 0x1ba   : > { %v1243_v57 = vsel %vm1233_vm3, nan, %v1242_v5 }
 0x1bd   : > { %v1946_v54 = vpop.eup %1945 }
 0x1be   : > { %v1948_v56 = vpop.eup %1947  ;;  %v1137_v17 = vxor.u32 2147483648, %v1946_v54 }
 0x1bf   : > { %v1134_v38 = vxor.u32 2147483648, %v1948_v56 }
 0x1c0   : > { %v1138_v37 = vsel %vm1136_vm6, %v1137_v17, %v1948_v56 }
 0x1c1   : > { %v1135_v47 = vsel %vm1133_vm2, %v1946_v54, %v1134_v38 }
 0x1c2   : > { %v1139_v10 = vsel %vm1132_vm5, %v1135_v47, %v1138_v37 }
 0x1c3   : > { %v1140_v25 = vsel %vm1130_vm15, nan, %v1139_v10 }
 0x1c4   : > { %1752 = vmatprep.mubr.f32.mxu0 %v1140_v25 }
 0x1c5   : > { %1753 = vmatmul.mubr.f32.gmra.mrb[14].mxu0 %v1243_v57 }
 0x268   : > { %v1789_v34 = vpop.f32.mrb[0].mxu1 }
 0x269   : > { %v1455_v23 = vpop.f32.mrb[1].mxu1 }
 0x26c   : > { %v1745_v63 = vpop.f32.mrb[8].mxu0  ;;  %v1792_v26 = vpop.f32.mrb[2].mxu1 }
 0x26d   : > { %v1461_v11 = vadd.f32 %v1789_v34, %v1745_v63  ;;  %v1350_v59 = vpop.f32.mrb[9].mxu0  ;;  %v1465_v53 = vpop.f32.mrb[3].mxu1 }
 0x26e   : > { %v1456_v43 = vadd.f32 %v1455_v23, %v1350_v59 }
 0x26f   : > { %v1502_v45 = vadd.f32 %v1637_v1, %v1461_v11 }
 0x270   : > { %v1501_v41 = vadd.f32 %v1637_v1, %v1456_v43  ;;  %v1795_v29 = vpop.f32.mrb[4].mxu1 }
 0x271   : > { %1510 = vst [vmem:[%s2846_s13 + $0x8] sm:$0xff] %v1502_v45  ;;  %v1475_v46 = vpop.f32.mrb[5].mxu1 }
 0x272   : > { %1509 = vst [vmem:[%s2846_s13] sm:$0xff] %v1501_v41 }
 0x274   : > { %v1798_v40 = vpop.f32.mrb[6].mxu1 }
 0x275   : > { %v1485_v6 = vpop.f32.mrb[7].mxu1 }
 0x276   : > { %v1748_v19 = vpop.f32.mrb[10].mxu0 }
 0x277   : > { %v1471_v24 = vadd.f32 %v1792_v26, %v1748_v19  ;;  %v1360_v60 = vpop.f32.mrb[11].mxu0 }
 0x278   : > { %v1466_v62 = vadd.f32 %v1465_v53, %v1360_v60 }
 0x279   : > { %v1504_v8 = vadd.f32 %v1637_v1, %v1471_v24 }
 0x27a   : > { %v1503_v21 = vadd.f32 %v1637_v1, %v1466_v62 }
 0x27b   : > { %1512 = vst [vmem:[%s2846_s13 + $0x18] sm:$0xff] %v1504_v8 }
 0x27c   : > { %1511 = vst [vmem:[%s2846_s13 + $0x10] sm:$0xff] %v1503_v21 }
 0x280   : > { %v1751_v12 = vpop.f32.mrb[12].mxu0 }
 0x281   : > { %v1481_v33 = vadd.f32 %v1795_v29, %v1751_v12  ;;  %v1370_v44 = vpop.f32.mrb[13].mxu0 }
 0x282   : > { %v1476_v35 = vadd.f32 %v1475_v46, %v1370_v44 }
 0x283   : > { %v1506_v48 = vadd.f32 %v1637_v1, %v1481_v33 }
 0x284   : > { %v1505_v58 = vadd.f32 %v1637_v1, %v1476_v35 }
 0x285   : > { %1514 = vst [vmem:[%s2846_s13 + $0x28] sm:$0xff] %v1506_v48 }
 0x286   : > { %1513 = vst [vmem:[%s2846_s13 + $0x20] sm:$0xff] %v1505_v58 }
 0x298   : > { %v1754_v14 = vpop.f32.mrb[14].mxu0 }
 0x299   : > { %v1491_v27 = vadd.f32 %v1798_v40, %v1754_v14  ;;  %v1380_v39 = vpop.f32.mrb[15].mxu0 }
 0x29a   : > { %v1486_v32 = vadd.f32 %v1485_v6, %v1380_v39 }
 0x29b   : > { %v1508_v61 = vadd.f32 %v1637_v1, %v1491_v27 }
 0x29c   : > { %v1507_v7 = vadd.f32 %v1637_v1, %v1486_v32 }
 0x29d   : > { %1516 = vst [vmem:[%s2846_s13 + $0x38] sm:$0xff] %v1508_v61 }
 0x29e   : > { %1515 = vst [vmem:[%s2846_s13 + $0x30] sm:$0xff] %v1507_v7 }
 0x29f PF: > { %s16_s21 = sadd.s32 1, %s1955_s21  }
 0x2a0   : > { %p13_p4 = scmp.ge.s32.totalorder %s16_s21, 6  }
 0x2a2   :  { %15 = sbr.rel (!%p13_p4) target bundleno = 1 (0x1), region = 77 }

</bundles_post_ra>
